<compile_context>
chip_gen: v7x
topology: tpu7x:2x2x1
jax: 0.10.0
libtpu: 0.0.40
codegen_flags: <defaults>
</compile_context>

<pallas_src>
import jax
import jax.numpy as jnp
from jax.experimental import pallas as pl
from jax.experimental.pallas import tpu as pltpu

NEG_SLOPE = 0.01  # PyTorch nn.LeakyReLU default

IN_DIM = 784
HID_DIM = 200
OUT_DIM = 10

HID_PAD = 256   # 200 -> 256 (2 x 128 lanes)
OUT_PAD = 128   # 10  -> 128 (1 x 128 lanes)

TILE_B = 256    # batch rows per grid step (fills 256-wide MXU; multiple of 128)


def _leaky_relu(x):
    # f32 epilogue on the MXU accumulator (VALU work, free while MXU is busy).
    return jnp.where(x >= 0, x, NEG_SLOPE * x)


def mlp_kernel(x_ref, w1_ref, b1_ref, w2_ref, b2_ref, w3_ref, b3_ref, o_ref):
    # Layer 1: (TILE_B, 784) @ (784, 256) -> f32 acc, + (1, 256) bias, LeakyReLU.
    h = jnp.dot(x_ref[...], w1_ref[...], preferred_element_type=jnp.float32)
    h = _leaky_relu(h + b1_ref[...])
    # Layer 2: (TILE_B, 256) @ (256, 256)
    h = jnp.dot(h.astype(w2_ref.dtype), w2_ref[...],
                preferred_element_type=jnp.float32)
    h = _leaky_relu(h + b2_ref[...])
    # Layer 3: (TILE_B, 256) @ (256, 128)
    h = jnp.dot(h.astype(w3_ref.dtype), w3_ref[...],
                preferred_element_type=jnp.float32)
    h = _leaky_relu(h + b3_ref[...])
    o_ref[...] = h.astype(o_ref.dtype)  # lane-dense (TILE_B, 128) store


def _pad_to(a, shape):
    pads = [(0, s - d) for d, s in zip(a.shape, shape)]
    return jnp.pad(a, pads)


def mlp_forward(x, params, *, tile_b=TILE_B, compute_dtype=jnp.bfloat16):
    """x: [B, 784] float32. params: dict with w1,b1,w2,b2,w3,b3 ([in,out] weights)."""
    B, F = x.shape
    assert F == IN_DIM

    n_tiles = pl.cdiv(B, tile_b)
    padded_b = n_tiles * tile_b

    # Pad batch to a multiple of the tile and cast activations to the MXU dtype.
    x_p = x if padded_b == B else jnp.pad(x, ((0, padded_b - B), (0, 0)))
    x_p = x_p.astype(compute_dtype)

    # Zero-pad features to lane-friendly sizes; padded columns stay exactly 0
    # through every LeakyReLU, so the visible outputs are unchanged.
    w1 = _pad_to(params["w1"], (IN_DIM, HID_PAD)).astype(compute_dtype)
    w2 = _pad_to(params["w2"], (HID_PAD, HID_PAD)).astype(compute_dtype)
    w3 = _pad_to(params["w3"], (HID_PAD, OUT_PAD)).astype(compute_dtype)
    b1 = _pad_to(params["b1"].reshape(1, -1), (1, HID_PAD)).astype(jnp.float32)
    b2 = _pad_to(params["b2"].reshape(1, -1), (1, HID_PAD)).astype(jnp.float32)
    b3 = _pad_to(params["b3"].reshape(1, -1), (1, OUT_PAD)).astype(jnp.float32)

    const = lambda i: (0, 0)  # weights/biases resident across all batch tiles

    out_padded = pl.pallas_call(
        mlp_kernel,
        out_shape=jax.ShapeDtypeStruct((padded_b, OUT_PAD), jnp.float32),
        grid=(n_tiles,),
        in_specs=[
            pl.BlockSpec((tile_b, IN_DIM), lambda i: (i, 0)),   # x tile
            pl.BlockSpec((IN_DIM, HID_PAD), const),             # w1
            pl.BlockSpec((1, HID_PAD), const),                  # b1
            pl.BlockSpec((HID_PAD, HID_PAD), const),            # w2
            pl.BlockSpec((1, HID_PAD), const),                  # b2
            pl.BlockSpec((HID_PAD, OUT_PAD), const),            # w3
            pl.BlockSpec((1, OUT_PAD), const),                  # b3
        ],
        out_specs=pl.BlockSpec((tile_b, OUT_PAD), lambda i: (i, 0)),
        compiler_params=pltpu.CompilerParams(
            dimension_semantics=("parallel",)),                 # 2 TCs on v7x
    )(x_p, w1, b1, w2, b2, w3, b3)

    return out_padded[:B, :OUT_DIM]


def init_params(key):
    """Deterministic init mimicking PyTorch nn.Linear default (uniform +-1/sqrt(fan_in)).
    Weights returned already transposed to [in_features, out_features], f32."""
    dims = [(IN_DIM, HID_DIM), (HID_DIM, HID_DIM), (HID_DIM, OUT_DIM)]
    params = {}
    keys = jax.random.split(key, 2 * len(dims))
    for i, (fan_in, fan_out) in enumerate(dims):
        bound = 1.0 / jnp.sqrt(jnp.float32(fan_in))
        w = jax.random.uniform(keys[2 * i], (fan_in, fan_out),
                               minval=-bound, maxval=bound, dtype=jnp.float32)
        b = jax.random.uniform(keys[2 * i + 1], (fan_out,),
                               minval=-bound, maxval=bound, dtype=jnp.float32)
        params[f"w{i + 1}"] = w
        params[f"b{i + 1}"] = b
    return params


if __name__ == "__main__":
    key = jax.random.PRNGKey(0)
    k_params, k_x = jax.random.split(key)
    params = init_params(k_params)

    # Non-multiple batch to exercise the grid (2 tiles of 256, last one partial).
    batch = 300
    x = jax.random.normal(k_x, (batch, IN_DIM), dtype=jnp.float32)

    out = mlp_forward(x, params)
    out = jax.block_until_ready(out)

    # Pure-JAX f32 reference of the same math (PyTorch semantics).
    def ref(x, p):
        h = x @ p["w1"] + p["b1"]
        h = jnp.where(h >= 0, h, NEG_SLOPE * h)
        h = h @ p["w2"] + p["b2"]
        h = jnp.where(h >= 0, h, NEG_SLOPE * h)
        h = h @ p["w3"] + p["b3"]
        return jnp.where(h >= 0, h, NEG_SLOPE * h)

    expected = ref(x, params)
    assert out.shape == (batch, OUT_DIM), out.shape
    # bf16 operands with f32 accumulation: loosened tolerance (intentional trade).
    assert jnp.allclose(out, expected, atol=3e-2, rtol=3e-2), (
        float(jnp.max(jnp.abs(out - expected))))
    print("KERNEL_OK")
</pallas_src>

<mosaic_0001>
module attributes {stable_mosaic.version = 11 : i64} {
  func.func @mlp_kernel(%arg0: i32, %arg1: memref<256x784xbf16, #tpu.memory_space<vmem>>, %arg2: memref<784x256xbf16, #tpu.memory_space<vmem>>, %arg3: memref<1x256xf32, #tpu.memory_space<vmem>>, %arg4: memref<256x256xbf16, #tpu.memory_space<vmem>>, %arg5: memref<1x256xf32, #tpu.memory_space<vmem>>, %arg6: memref<256x128xbf16, #tpu.memory_space<vmem>>, %arg7: memref<1x128xf32, #tpu.memory_space<vmem>>, %arg8: memref<256x128xf32, #tpu.memory_space<vmem>>) attributes {dimension_semantics = [#tpu.dimension_semantics<parallel>], iteration_bounds = array<i64: 2>, scalar_prefetch = 0 : i64, scratch_operands = 0 : i64, tpu.core_type = #tpu.core_type<tc>, window_params = [{transform_indices = @transform_0, window_bounds = array<i64: 256, 784>}, {pipeline_mode = #tpu.pipeline_mode<synchronous>, transform_indices = @transform_1, window_bounds = array<i64: 784, 256>}, {pipeline_mode = #tpu.pipeline_mode<synchronous>, transform_indices = @transform_2, window_bounds = array<i64: 1, 256>}, {pipeline_mode = #tpu.pipeline_mode<synchronous>, transform_indices = @transform_3, window_bounds = array<i64: 256, 256>}, {pipeline_mode = #tpu.pipeline_mode<synchronous>, transform_indices = @transform_4, window_bounds = array<i64: 1, 256>}, {pipeline_mode = #tpu.pipeline_mode<synchronous>, transform_indices = @transform_5, window_bounds = array<i64: 256, 128>}, {pipeline_mode = #tpu.pipeline_mode<synchronous>, transform_indices = @transform_6, window_bounds = array<i64: 1, 128>}, {transform_indices = @transform_7, window_bounds = array<i64: 256, 128>}]} {
    %c0 = arith.constant 0 : index
    %c0_0 = arith.constant 0 : index
    %0 = vector.load %arg1[%c0, %c0_0] : memref<256x784xbf16, #tpu.memory_space<vmem>>, vector<256x784xbf16>
    %c0_1 = arith.constant 0 : index
    %c0_2 = arith.constant 0 : index
    %1 = vector.load %arg2[%c0_1, %c0_2] : memref<784x256xbf16, #tpu.memory_space<vmem>>, vector<784x256xbf16>
    %cst = arith.constant dense<0.000000e+00> : vector<256x256xf32>
    %2 = tpu.matmul %0, %1, %cst {dimension_numbers = #tpu.dot_dimension_numbers<[1], [0], [0], [1], [0, 0, 1, 1], [], []>} : vector<256x784xbf16>, vector<784x256xbf16>, vector<256x256xf32> -> vector<256x256xf32>
    %c0_3 = arith.constant 0 : index
    %c0_4 = arith.constant 0 : index
    %3 = vector.load %arg3[%c0_3, %c0_4] : memref<1x256xf32, #tpu.memory_space<vmem>>, vector<1x256xf32>
    %4 = vector.broadcast %3 : vector<1x256xf32> to vector<256x256xf32>
    %5 = arith.addf %2, %4 : vector<256x256xf32>
    %cst_5 = arith.constant 0.000000e+00 : f32
    %6 = vector.broadcast %cst_5 : f32 to vector<256x256xf32>
    %7 = arith.cmpf oge, %5, %6 : vector<256x256xf32>
    %cst_6 = arith.constant 0.00999999977 : f32
    %8 = vector.broadcast %cst_6 : f32 to vector<256x256xf32>
    %9 = arith.mulf %8, %5 : vector<256x256xf32>
    %10 = arith.select %7, %5, %9 : vector<256x256xi1>, vector<256x256xf32>
    %11 = arith.truncf %10 : vector<256x256xf32> to vector<256x256xbf16>
    %c0_7 = arith.constant 0 : index
    %c0_8 = arith.constant 0 : index
    %12 = vector.load %arg4[%c0_7, %c0_8] : memref<256x256xbf16, #tpu.memory_space<vmem>>, vector<256x256xbf16>
    %cst_9 = arith.constant dense<0.000000e+00> : vector<256x256xf32>
    %13 = tpu.matmul %11, %12, %cst_9 {dimension_numbers = #tpu.dot_dimension_numbers<[1], [0], [0], [1], [0, 0, 1, 1], [], []>} : vector<256x256xbf16>, vector<256x256xbf16>, vector<256x256xf32> -> vector<256x256xf32>
    %c0_10 = arith.constant 0 : index
    %c0_11 = arith.constant 0 : index
    %14 = vector.load %arg5[%c0_10, %c0_11] : memref<1x256xf32, #tpu.memory_space<vmem>>, vector<1x256xf32>
    %15 = vector.broadcast %14 : vector<1x256xf32> to vector<256x256xf32>
    %16 = arith.addf %13, %15 : vector<256x256xf32>
    %cst_12 = arith.constant 0.000000e+00 : f32
    %17 = vector.broadcast %cst_12 : f32 to vector<256x256xf32>
    %18 = arith.cmpf oge, %16, %17 : vector<256x256xf32>
    %cst_13 = arith.constant 0.00999999977 : f32
    %19 = vector.broadcast %cst_13 : f32 to vector<256x256xf32>
    %20 = arith.mulf %19, %16 : vector<256x256xf32>
    %21 = arith.select %18, %16, %20 : vector<256x256xi1>, vector<256x256xf32>
    %22 = arith.truncf %21 : vector<256x256xf32> to vector<256x256xbf16>
    %c0_14 = arith.constant 0 : index
    %c0_15 = arith.constant 0 : index
    %23 = vector.load %arg6[%c0_14, %c0_15] : memref<256x128xbf16, #tpu.memory_space<vmem>>, vector<256x128xbf16>
    %cst_16 = arith.constant dense<0.000000e+00> : vector<256x128xf32>
    %24 = tpu.matmul %22, %23, %cst_16 {dimension_numbers = #tpu.dot_dimension_numbers<[1], [0], [0], [1], [0, 0, 1, 1], [], []>} : vector<256x256xbf16>, vector<256x128xbf16>, vector<256x128xf32> -> vector<256x128xf32>
    %c0_17 = arith.constant 0 : index
    %c0_18 = arith.constant 0 : index
    %25 = vector.load %arg7[%c0_17, %c0_18] : memref<1x128xf32, #tpu.memory_space<vmem>>, vector<1x128xf32>
    %26 = vector.broadcast %25 : vector<1x128xf32> to vector<256x128xf32>
    %27 = arith.addf %24, %26 : vector<256x128xf32>
    %cst_19 = arith.constant 0.000000e+00 : f32
    %28 = vector.broadcast %cst_19 : f32 to vector<256x128xf32>
    %29 = arith.cmpf oge, %27, %28 : vector<256x128xf32>
    %cst_20 = arith.constant 0.00999999977 : f32
    %30 = vector.broadcast %cst_20 : f32 to vector<256x128xf32>
    %31 = arith.mulf %30, %27 : vector<256x128xf32>
    %32 = arith.select %29, %27, %31 : vector<256x128xi1>, vector<256x128xf32>
    %c0_21 = arith.constant 0 : index
    %c0_22 = arith.constant 0 : index
    %33 = vector.load %arg8[%c0_21, %c0_22] : memref<256x128xf32, #tpu.memory_space<vmem>>, vector<256x128xf32>
    tpu.vector_store %arg8[%c0_21, %c0_22], %32 {strides = array<i32>} : memref<256x128xf32, #tpu.memory_space<vmem>>, vector<256x128xf32>,
    return
  }
  func.func @transform_0(%arg0: i32) -> (i32, i32) {
    %c0_i32 = arith.constant 0 : i32
    %c0_i32_0 = arith.constant 0 : i32
    return %arg0, %c0_i32 : i32, i32
  }
  func.func @transform_1(%arg0: i32) -> (i32, i32) {
    %c0_i32 = arith.constant 0 : i32
    %c0_i32_0 = arith.constant 0 : i32
    %c0_i32_1 = arith.constant 0 : i32
    return %c0_i32, %c0_i32_0 : i32, i32
  }
  func.func @transform_2(%arg0: i32) -> (i32, i32) {
    %c0_i32 = arith.constant 0 : i32
    %c0_i32_0 = arith.constant 0 : i32
    %c0_i32_1 = arith.constant 0 : i32
    return %c0_i32, %c0_i32_0 : i32, i32
  }
  func.func @transform_3(%arg0: i32) -> (i32, i32) {
    %c0_i32 = arith.constant 0 : i32
    %c0_i32_0 = arith.constant 0 : i32
    %c0_i32_1 = arith.constant 0 : i32
    return %c0_i32, %c0_i32_0 : i32, i32
  }
  func.func @transform_4(%arg0: i32) -> (i32, i32) {
    %c0_i32 = arith.constant 0 : i32
    %c0_i32_0 = arith.constant 0 : i32
    %c0_i32_1 = arith.constant 0 : i32
    return %c0_i32, %c0_i32_0 : i32, i32
  }
  func.func @transform_5(%arg0: i32) -> (i32, i32) {
    %c0_i32 = arith.constant 0 : i32
    %c0_i32_0 = arith.constant 0 : i32
    %c0_i32_1 = arith.constant 0 : i32
    return %c0_i32, %c0_i32_0 : i32, i32
  }
  func.func @transform_6(%arg0: i32) -> (i32, i32) {
    %c0_i32 = arith.constant 0 : i32
    %c0_i32_0 = arith.constant 0 : i32
    %c0_i32_1 = arith.constant 0 : i32
    return %c0_i32, %c0_i32_0 : i32, i32
  }
  func.func @transform_7(%arg0: i32) -> (i32, i32) {
    %c0_i32 = arith.constant 0 : i32
    %c0_i32_0 = arith.constant 0 : i32
    return %arg0, %c0_i32 : i32, i32
  }
}

</mosaic_0001>

<bundles_post_ra>
// kernel: tpu_custom_call.1
= control target key start
LH: loop header
LB: loop body
LE: loop exit
PB: predicated region body
PF: predicated region fallthrough
CT: control target
= control target key end

     0   :  { %12 = vsyncpa [#allocation3], 0  ;;  %s6024_s0 = inlined_call_operand.vmem [shape: bf16[512,784], index: 0, kind: input, shape index: {}]   ;;  %s6025_s1 = inlined_call_operand.vmem [shape: bf16[784,256], index: 1, kind: input, shape index: {}]   ;;  %s6026_s2 = inlined_call_operand.vmem [shape: f32[1,256], index: 2, kind: input, shape index: {}]   ;;  %s6027_s3 = inlined_call_operand.vmem [shape: bf16[256,256], index: 3, kind: input, shape index: {}]   ;;  %s6028_s4 = inlined_call_operand.vmem [shape: f32[1,256], index: 4, kind: input, shape index: {}]   ;;  %s6029_s5 = inlined_call_operand.vmem [shape: bf16[256,128], index: 5, kind: input, shape index: {}]   ;;  %s6030_s6 = inlined_call_operand.vmem [shape: f32[1,128], index: 6, kind: input, shape index: {}]   ;;  %s6031_s7 = inlined_call_operand.hbm [shape: f32[512,128], index: 7, kind: output, shape index: {}]  }
   0x1   :  { %14 = vsyncpa [#allocation3 + $0x1], 0  ;;  %s4916_s24 = smov 0   ;;  %s4918_s25 = smov 0  }
   0x2   :  { %s4920_s26 = smov 0   ;;  %s4922_s27 = smov 0  }
   0x3 LB: > { %s4937_s28 = sadd.s32 4294967295, %s4870_s27   ;;  %s3738_s29 = sadd.s32 4294967294, %s4870_s27   ;;  %s4870_s27 = sphi %s4922_s27, %s6083_s27   ;;  %s4866_s26 = sphi %s4920_s26, %s6082_s26   ;;  %s4862_s25 = sphi %s4918_s25, %s6081_s25   ;;  %s4858_s24 = sphi %s4916_s24, %s6080_s24  }
   0x4   : > { %s4941_s30 = sadd.s32 1, %s4870_s27   ;;  %s179_s8 = sadd.s32 1, %s4866_s26 }
   0x5   : > { %s176_s9 = ssub.s32 %s4870_s27, %s4941_s30  ;;  %p189_p0 = scmp.ne.s32.totalorder %s4866_s26, %s4862_s25 }
   0x6   : > { %p177_p1 = scmp.eq.s32.totalorder %s176_s9, 0  ;;  %p190_p2 = scmp.eq.s32.totalorder %s4937_s28, 1 }
   0x7   : > { %p195_p3 = scmp.ne.s32.totalorder %s4862_s25, %s4858_s24  ;;  %p196_p4 = scmp.eq.s32.totalorder %s3738_s29, 1 }
   0x8   : > { %s4952_s10 = scalar_select %p177_p1, %s4866_s26, %s179_s8  }
   0x9   : > { %p4954_p5 = por %p190_p2, %p189_p0  ;;  %p4958_p6 = por %p196_p4, %p195_p3 }
   0xa   : > { %p3741_p7 = scmp.ge.s32.totalorder %s4870_s27, 1  ;;  %p242_p8 = scmp.lt.s32.totalorder %s4870_s27, 3 }
   0xc   : > { %p243_p9 = pnand %p3741_p7, %p242_p8 }
   0xe   : > { %246 = sbr.rel (%p243_p9) target bundleno = 1145 (0x479), region = 48 }
  0x15   : > { %v4437_v0 = vld [vmem:[%s6025_s1 + $0x104] ss:$8 sps:$4 sm:$0xff]   ;;  %v4439_v1 = vld [vmem:[%s6025_s1 + $0x100] ss:$8 sps:$4 sm:$0xff]   ;;  %v4440_v2 = vld [vmem:[%s6025_s1 + $0x114] ss:$8 sps:$4 sm:$0xff]  }
  0x16   : > { %1814 = vmatprep.subr.bf16.mxu0 %v4437_v0  ;;  %v4442_v3 = vld [vmem:[%s6025_s1 + $0x110] ss:$8 sps:$4 sm:$0xff]   ;;  %v4443_v4 = vld [vmem:[%s6025_s1 + $0x124] ss:$8 sps:$4 sm:$0xff]   ;;  %s3743_s23 = sshll.u32 %s4937_s28, 5  ;;  %vm1572_vm0 = vcmask 130048  }
  0x17   : > { %1815 = vmatpush1.bf16.msra.mxu0 %v4439_v1  ;;  %v4445_v5 = vld [vmem:[%s6025_s1 + $0x120] ss:$8 sps:$4 sm:$0xff]   ;;  %p276_p10 = scmp.lt.s32.totalorder %s3743_s23, 63  ;;  %v4446_v6 = vld [vmem:[%s6025_s1 + $0x134] ss:$8 sps:$4 sm:$0xff]   ;;  %s272_s29 = sand.u32 1, %s4862_s25  }
  0x18   : > { %1816 = vmatprep.subr.bf16.mxu0 %v4440_v2  ;;  %v4448_v7 = vld [vmem:[%s6025_s1 + $0x130] ss:$8 sps:$4 sm:$0xff]   ;;  %v4449_v8 = vld [vmem:[%s6025_s1 + $0x144] ss:$8 sps:$4 sm:$0xff]   ;;  %v4451_v9 = vld [vmem:[%s6025_s1 + $0x140] ss:$8 sps:$4 sm:$0xff]  }
  0x19   : > { %s6085_s23 = smov (!%p276_p10, %s3743_s23), 63  ;;  %v4452_v10 = vld [vmem:[%s6025_s1 + $0x154] ss:$8 sps:$4 sm:$0xff]   ;;  %v4454_v11 = vld [vmem:[%s6025_s1 + $0x150] ss:$8 sps:$4 sm:$0xff]   ;;  %s3742_s13 = sshll.u32 %s272_s29, 8 }
  0x1a   : > { %s4394_s20 = smul.u32 28, %s6085_s23  ;;  %v4455_v12 = vld [vmem:[%s6025_s1 + $0x164] ss:$8 sps:$4 sm:$0xff]   ;;  %v4457_v14 = vld [vmem:[%s6025_s1 + $0x160] ss:$8 sps:$4 sm:$0xff]   ;;  %s5908_s15 = scalar_lea.vmem [#allocation2], %s3742_s13 }
  0x1b   : > { %1817 = vmatpush1.bf16.msra.mxu0 %v4442_v3  ;;  %v4458_v15 = vld [vmem:[%s6025_s1 + $0x174] ss:$8 sps:$4 sm:$0xff]   ;;  %v4460_v16 = vld [vmem:[%s6025_s1 + $0x170] ss:$8 sps:$4 sm:$0xff]   ;;  %v4461_v17 = vld [vmem:[%s6025_s1 + $0x184] ss:$8 sps:$4 sm:$0xff]  }
  0x1c   : > { %1818 = vmatprep.subr.bf16.mxu0 %v4443_v4  ;;  %s5004_s14 = scalar_lea.vmem %s6024_s0, %s4394_s20  ;;  %v4463_v18 = vld [vmem:[%s6025_s1 + $0x180] ss:$8 sps:$4 sm:$0xff]   ;;  %v4464_v19 = vld [vmem:[%s6025_s1 + $0x194] ss:$8 sps:$4 sm:$0xff]   ;;  %v4466_v20 = vld [vmem:[%s6025_s1 + $0x190] ss:$8 sps:$4 sm:$0xff]  }
  0x1d   : > { %v4487_v13 = vld [vmem:[%s5004_s14 + $0xc] ss:$28 sps:$4 sm:$0xff]   ;;  %v4470_v23 = vld [vmem:[%s6025_s1 + $0x1b4] ss:$8 sps:$4 sm:$0xff]   ;;  %v4472_v24 = vld [vmem:[%s6025_s1 + $0x1b0] ss:$8 sps:$4 sm:$0xff]  }
  0x1e   : > { %1846 = vmatprep.mubr.bf16.mxu0 %v4487_v13  ;;  %v4467_v21 = vld [vmem:[%s6025_s1 + $0x1a4] ss:$8 sps:$4 sm:$0xff]   ;;  %v4469_v22 = vld [vmem:[%s6025_s1 + $0x1a0] ss:$8 sps:$4 sm:$0xff]   ;;  %v4476_v27 = vld [vmem:[%s6025_s1 + $0x1d4] ss:$8 sps:$4 sm:$0xff]  }
  0x1f   : > { %1819 = vmatpush1.bf16.msra.mxu0 %v4445_v5  ;;  %v4473_v25 = vld [vmem:[%s6025_s1 + $0x1c4] ss:$8 sps:$4 sm:$0xff]   ;;  %v4475_v26 = vld [vmem:[%s6025_s1 + $0x1c0] ss:$8 sps:$4 sm:$0xff]   ;;  %v4478_v28 = vld [vmem:[%s6025_s1 + $0x1d0] ss:$8 sps:$4 sm:$0xff]  }
  0x20   : > { %1820 = vmatprep.subr.bf16.mxu0 %v4446_v6  ;;  %v4479_v29 = vld [vmem:[%s6025_s1 + $0x1e4] ss:$8 sps:$4 sm:$0xff]   ;;  %v4481_v30 = vld [vmem:[%s6025_s1 + $0x1e0] ss:$8 sps:$4 sm:$0xff]   ;;  %v4482_v31 = vld [vmem:[%s6025_s1 + $0x1f4] ss:$8 sps:$4 sm:$0xff]  }
  0x21   : > { %v4484_v32 = vld [vmem:[%s6025_s1 + $0x1f0] ss:$8 sps:$4 sm:$0xff]   ;;  %v4490_v33 = vld [vmem:[%s6025_s1 + $0x204] ss:$8 sps:$4 sm:$0xff]   ;;  %v4488_v35 = vld [vmem:[%s6025_s1 + $0x200] ss:$8 sps:$4 sm:$0xff]  }
  0x22   : > { %v4485_v34 = vld [vmem:[%s5004_s14 + $0x8] ss:$28 sps:$4 sm:$0xff]   ;;  %v4496_v37 = vld [vmem:[%s6025_s1 + $0x214] ss:$8 sps:$4 sm:$0xff]   ;;  %v4494_v38 = vld [vmem:[%s6025_s1 + $0x210] ss:$8 sps:$4 sm:$0xff]  }
  0x23   : > { %1821 = vmatpush1.bf16.msra.mxu0 %v4448_v7  ;;  %v4491_v36 = vld [vmem:[%s5004_s14 + $0x44] ss:$28 sps:$4 sm:$0xff]   ;;  %v4497_v41 = vld [vmem:[%s5004_s14 + $0x7c] ss:$28 sps:$4 sm:$0xff]   ;;  %v4503_v47 = vld [vmem:[%s5004_s14 + $0xb4] ss:$28 sps:$4 sm:$0xff]  }
  0x24   : > { %1822 = vmatprep.subr.bf16.mxu0 %v4449_v8  ;;  %v4502_v39 = vld [vmem:[%s6025_s1 + $0x224] ss:$8 sps:$4 sm:$0xff]   ;;  %v4493_v40 = vld [vmem:[%s5004_s14 + $0x40] ss:$28 sps:$4 sm:$0xff]   ;;  %v4506_v44 = vld [vmem:[%s6025_s1 + $0x230] ss:$8 sps:$4 sm:$0xff]  }
  0x25   : > { %v4500_v42 = vld [vmem:[%s6025_s1 + $0x220] ss:$8 sps:$4 sm:$0xff]   ;;  %v4508_v43 = vld [vmem:[%s6025_s1 + $0x234] ss:$8 sps:$4 sm:$0xff]   ;;  %v4514_v45 = vld [vmem:[%s6025_s1 + $0x244] ss:$8 sps:$4 sm:$0xff]  }
  0x26   : > { %v4499_v46 = vld [vmem:[%s5004_s14 + $0x78] ss:$28 sps:$4 sm:$0xff]   ;;  %v4512_v48 = vld [vmem:[%s6025_s1 + $0x240] ss:$8 sps:$4 sm:$0xff]   ;;  %v4526_v51 = vld [vmem:[%s6025_s1 + $0x264] ss:$8 sps:$4 sm:$0xff]  }
  0x27   : > { %1823 = vmatpush1.bf16.msra.mxu0 %v4451_v9  ;;  %v4520_v49 = vld [vmem:[%s6025_s1 + $0x254] ss:$8 sps:$4 sm:$0xff]   ;;  %v4518_v50 = vld [vmem:[%s6025_s1 + $0x250] ss:$8 sps:$4 sm:$0xff]   ;;  %v4509_v53 = vld [vmem:[%s5004_s14 + $0xec] ss:$28 sps:$4 sm:$0xff]  }
  0x28   : > { %1824 = vmatprep.subr.bf16.mxu0 %v4452_v10  ;;  %v4505_v52 = vld [vmem:[%s5004_s14 + $0xb0] ss:$28 sps:$4 sm:$0xff]   ;;  %v4524_v54 = vld [vmem:[%s6025_s1 + $0x260] ss:$8 sps:$4 sm:$0xff]   ;;  %v4532_v55 = vld [vmem:[%s6025_s1 + $0x274] ss:$8 sps:$4 sm:$0xff]  }
  0x29   : > { %v4530_v56 = vld [vmem:[%s6025_s1 + $0x270] ss:$8 sps:$4 sm:$0xff]   ;;  %v4538_v57 = vld [vmem:[%s6025_s1 + $0x284] ss:$8 sps:$4 sm:$0xff]   ;;  %v4536_v60 = vld [vmem:[%s6025_s1 + $0x280] ss:$8 sps:$4 sm:$0xff]  }
  0x2a   : > { %v4511_v58 = vld [vmem:[%s5004_s14 + $0xe8] ss:$28 sps:$4 sm:$0xff]   ;;  %v4544_v61 = vld [vmem:[%s6025_s1 + $0x294] ss:$8 sps:$4 sm:$0xff]   ;;  %v4542_v62 = vld [vmem:[%s6025_s1 + $0x290] ss:$8 sps:$4 sm:$0xff]  }
  0x2b   : > { %1825 = vmatpush1.bf16.msra.mxu0 %v4454_v11  ;;  %v4515_v59 = vld [vmem:[%s5004_s14 + $0x124] ss:$28 sps:$4 sm:$0xff]   ;;  %v4521_v1 = vld [vmem:[%s5004_s14 + $0x15c] ss:$28 sps:$4 sm:$0xff]   ;;  %v4527_v7 = vld [vmem:[%s5004_s14 + $0x194] ss:$28 sps:$4 sm:$0xff]  }
  0x2c   : > { %1826 = vmatprep.subr.bf16.mxu0 %v4455_v12  ;;  %v4550_v63 = vld [vmem:[%s6025_s1 + $0x2a4] ss:$8 sps:$4 sm:$0xff]   ;;  %v4517_v0 = vld [vmem:[%s5004_s14 + $0x120] ss:$28 sps:$4 sm:$0xff]   ;;  %v4554_v4 = vld [vmem:[%s6025_s1 + $0x2b0] ss:$8 sps:$4 sm:$0xff]  }
  0x2d   : > { %v4548_v2 = vld [vmem:[%s6025_s1 + $0x2a0] ss:$8 sps:$4 sm:$0xff]   ;;  %v4556_v3 = vld [vmem:[%s6025_s1 + $0x2b4] ss:$8 sps:$4 sm:$0xff]   ;;  %v4562_v5 = vld [vmem:[%s6025_s1 + $0x2c4] ss:$8 sps:$4 sm:$0xff]  }
  0x2e   : > { %v4523_v6 = vld [vmem:[%s5004_s14 + $0x158] ss:$28 sps:$4 sm:$0xff]   ;;  %v4560_v8 = vld [vmem:[%s6025_s1 + $0x2c0] ss:$8 sps:$4 sm:$0xff]   ;;  %v4574_v11 = vld [vmem:[%s6025_s1 + $0x2e4] ss:$8 sps:$4 sm:$0xff]  }
  0x2f   : > { %1827 = vmatpush1.bf16.msra.mxu0 %v4457_v14  ;;  %v4568_v9 = vld [vmem:[%s6025_s1 + $0x2d4] ss:$8 sps:$4 sm:$0xff]   ;;  %v4566_v10 = vld [vmem:[%s6025_s1 + $0x2d0] ss:$8 sps:$4 sm:$0xff]   ;;  %v4533_v13 = vld [vmem:[%s5004_s14 + $0x1cc] ss:$28 sps:$4 sm:$0xff]  }
  0x30   : > { %1828 = vmatprep.subr.bf16.mxu0 %v4458_v15  ;;  %v4529_v12 = vld [vmem:[%s5004_s14 + $0x190] ss:$28 sps:$4 sm:$0xff]   ;;  %v4572_v14 = vld [vmem:[%s6025_s1 + $0x2e0] ss:$8 sps:$4 sm:$0xff]   ;;  %v4580_v15 = vld [vmem:[%s6025_s1 + $0x2f4] ss:$8 sps:$4 sm:$0xff]  }
  0x31   : > { %s4025_s16 = sshll.u32 %s4937_s28, 12  ;;  %s5983_s28 = scalar_lea.sflag [#allocation3], %s272_s29 }
  0x32   : > { %s5975_s18 = scalar_lea.hbm %s6031_s7, %s4025_s16  ;;  %s4873_s20 = smov [#allocation2]  }
  0x33   : > { %1829 = vmatpush1.bf16.msra.mxu0 %v4460_v16  ;;  %v4578_v16 = vld [vmem:[%s6025_s1 + $0x2f0] ss:$8 sps:$4 sm:$0xff]   ;;  %s4812_s21 = sshll.u32 %s4873_s20, 4  ;;  %s4813_s21 = int_to_ptr.vmem [resolvable:$false] %s4812_s21 }
  0x34   : > { %1830 = vmatprep.subr.bf16.mxu0 %v4461_v17  ;;  %v4608_v17 = vld [vmem:[%s6025_s1 + $0x4] ss:$8 sps:$4 sm:$0xff]   ;;  %s4814_s22 = scalar_lea.vmem %s4813_s21, 8192 }
  0x35   : > { %1621 = vmatprep.subr.bf16.mxu1 %v4608_v17  ;;  %v4595_v17 = vld [vmem:[%s5004_s14 + $0xb8] ss:$28 sps:$4 sm:$0xff]  }
  0x37   : > { %1831 = vmatpush1.bf16.msra.mxu0 %v4463_v18  ;;  %v4610_v18 = vld [vmem:[%s6025_s1] ss:$8 sps:$4 sm:$0xff]  }
  0x38   : > { %1832 = vmatprep.subr.bf16.mxu0 %v4464_v19  ;;  %v4586_v19 = vld [vmem:[%s6025_s1 + $0x304] ss:$8 sps:$4 sm:$0xff]   ;;  %1622 = vmatpush1.bf16.msra.mxu1 %v4610_v18  ;;  %v4596_v18 = vld [vmem:[%s5004_s14 + $0xf4] ss:$28 sps:$4 sm:$0xff]  }
  0x3b   : > { %1833 = vmatpush1.bf16.msra.mxu0 %v4466_v20  ;;  %v4613_v20 = vld [vmem:[%s6025_s1 + $0x14] ss:$8 sps:$4 sm:$0xff]  }
  0x3c   : > { %1834 = vmatprep.subr.bf16.mxu0 %v4467_v21  ;;  %v4535_v21 = vld [vmem:[%s5004_s14 + $0x1c8] ss:$28 sps:$4 sm:$0xff]   ;;  %1623 = vmatprep.subr.bf16.mxu1 %v4613_v20  ;;  %v4698_v20 = vld [vmem:[%s5004_s14 + $0xe0] ss:$28 sps:$4 sm:$0xff]  }
  0x3f   : > { %1835 = vmatpush1.bf16.msra.mxu0 %v4469_v22  ;;  %v4539_v22 = vld [vmem:[%s5004_s14 + $0x204] ss:$28 sps:$4 sm:$0xff]  }
  0x40   : > { %1836 = vmatprep.subr.bf16.mxu0 %v4470_v23  ;;  %v4616_v23 = vld [vmem:[%s6025_s1 + $0x10] ss:$8 sps:$4 sm:$0xff]  }
  0x41   : > { %1624 = vmatpush1.bf16.msra.mxu1 %v4616_v23  ;;  %v4700_v23 = vld [vmem:[%s5004_s14 + $0x11c] ss:$28 sps:$4 sm:$0xff]  }
  0x43   : > { %1837 = vmatpush1.bf16.msra.mxu0 %v4472_v24  ;;  %v4617_v24 = vld [vmem:[%s6025_s1 + $0x24] ss:$8 sps:$4 sm:$0xff]  }
  0x44   : > { %1838 = vmatprep.subr.bf16.mxu0 %v4473_v25  ;;  %v4619_v25 = vld [vmem:[%s6025_s1 + $0x20] ss:$8 sps:$4 sm:$0xff]   ;;  %1625 = vmatprep.subr.bf16.mxu1 %v4617_v24  ;;  %v4702_v24 = vld [vmem:[%s5004_s14 + $0x118] ss:$28 sps:$4 sm:$0xff]  }
  0x45   : > { %1626 = vmatpush1.bf16.msra.mxu1 %v4619_v25  ;;  %v4601_v25 = vld [vmem:[%s5004_s14 + $0x128] ss:$28 sps:$4 sm:$0xff]  }
  0x47   : > { %1839 = vmatpush1.bf16.msra.mxu0 %v4475_v26  ;;  %v4622_v26 = vld [vmem:[%s6025_s1 + $0x34] ss:$8 sps:$4 sm:$0xff]  }
  0x48   : > { %1840 = vmatprep.subr.bf16.mxu0 %v4476_v27  ;;  %v4541_v27 = vld [vmem:[%s5004_s14 + $0x200] ss:$28 sps:$4 sm:$0xff]   ;;  %1627 = vmatprep.subr.bf16.mxu1 %v4622_v26 }
  0x49   : > { %v4602_v26 = vld [vmem:[%s5004_s14 + $0x164] ss:$28 sps:$4 sm:$0xff]  }
  0x4b   : > { %1841 = vmatpush1.bf16.msra.mxu0 %v4478_v28  ;;  %v4545_v28 = vld [vmem:[%s5004_s14 + $0x23c] ss:$28 sps:$4 sm:$0xff]  }
  0x4c   : > { %1842 = vmatprep.subr.bf16.mxu0 %v4479_v29  ;;  %v4625_v29 = vld [vmem:[%s6025_s1 + $0x30] ss:$8 sps:$4 sm:$0xff]  }
  0x4d   : > { %1628 = vmatpush1.bf16.msra.mxu1 %v4625_v29  ;;  %v4604_v29 = vld [vmem:[%s5004_s14 + $0x160] ss:$28 sps:$4 sm:$0xff]  }
  0x4f   : > { %1843 = vmatpush1.bf16.msra.mxu0 %v4481_v30  ;;  %v4626_v30 = vld [vmem:[%s6025_s1 + $0x44] ss:$8 sps:$4 sm:$0xff]  }
  0x50   : > { %1844 = vmatprep.subr.bf16.mxu0 %v4482_v31  ;;  %v4628_v31 = vld [vmem:[%s6025_s1 + $0x40] ss:$8 sps:$4 sm:$0xff]   ;;  %1629 = vmatprep.subr.bf16.mxu1 %v4626_v30  ;;  %v4605_v30 = vld [vmem:[%s5004_s14 + $0x19c] ss:$28 sps:$4 sm:$0xff]  }
  0x51   : > { %1630 = vmatpush1.bf16.msra.mxu1 %v4628_v31  ;;  %v4708_v31 = vld [vmem:[%s5004_s14 + $0x18c] ss:$28 sps:$4 sm:$0xff]  }
  0x53   : > { %1845 = vmatpush1.bf16.msra.mxu0 %v4484_v32  ;;  %v4631_v32 = vld [vmem:[%s6025_s1 + $0x54] ss:$8 sps:$4 sm:$0xff]  }
  0x54   : > { %2007 = vmatprep.subr.bf16.mxu0 %v4490_v33  ;;  %v4547_v33 = vld [vmem:[%s5004_s14 + $0x238] ss:$28 sps:$4 sm:$0xff]   ;;  %1631 = vmatprep.subr.bf16.mxu1 %v4631_v32  ;;  %v4710_v32 = vld [vmem:[%s5004_s14 + $0x188] ss:$28 sps:$4 sm:$0xff]  }
  0x56   : > { %1847 = vmatmul.mubr.bf16.vlgmr.msra.gmra.mrb[0].mxu0 %v4485_v34  ;;  %v4551_v34 = vld [vmem:[%s5004_s14 + $0x274] ss:$28 sps:$4 sm:$0xff]  }
  0x57   : > { %2008 = vmatpush1.bf16.msra.mxu0 %v4488_v35  ;;  %1856 = vmatprep.mubr.bf16.mxu0 %v4491_v36  ;;  %v4634_v35 = vld [vmem:[%s6025_s1 + $0x50] ss:$8 sps:$4 sm:$0xff]   ;;  %v4635_v36 = vld [vmem:[%s6025_s1 + $0x64] ss:$8 sps:$4 sm:$0xff]  }
  0x58   : > { %2009 = vmatprep.subr.bf16.mxu0 %v4496_v37  ;;  %1632 = vmatpush1.bf16.msra.mxu1 %v4634_v35  ;;  %v4637_v37 = vld [vmem:[%s6025_s1 + $0x60] ss:$8 sps:$4 sm:$0xff]  }
  0x59   : > { %1633 = vmatprep.subr.bf16.mxu1 %v4635_v36  ;;  %v4712_v35 = vld [vmem:[%s5004_s14 + $0x1c4] ss:$28 sps:$4 sm:$0xff]  }
  0x5a   : > { %v4714_v36 = vld [vmem:[%s5004_s14 + $0x1c0] ss:$28 sps:$4 sm:$0xff]  }
  0x5b   : > { %2010 = vmatpush1.bf16.msra.mxu0 %v4494_v38  ;;  %v4640_v38 = vld [vmem:[%s6025_s1 + $0x74] ss:$8 sps:$4 sm:$0xff]  }
  0x5c   : > { %2011 = vmatprep.subr.bf16.mxu0 %v4502_v39  ;;  %v4553_v39 = vld [vmem:[%s5004_s14 + $0x270] ss:$28 sps:$4 sm:$0xff]   ;;  %1634 = vmatpush1.bf16.msra.mxu1 %v4637_v37 }
  0x5d   : > { %1635 = vmatprep.subr.bf16.mxu1 %v4640_v38  ;;  %v4615_v37 = vld [vmem:[%s5004_s14 + $0x1d0] ss:$28 sps:$4 sm:$0xff]  }
  0x5e   : > { %1857 = vmatmul.mubr.bf16.gmra.mrb[4].mxu0 %v4493_v40  ;;  %v4557_v40 = vld [vmem:[%s5004_s14 + $0x2ac] ss:$28 sps:$4 sm:$0xff]  }
  0x5f   : > { %1866 = vmatprep.mubr.bf16.mxu0 %v4497_v41  ;;  %2012 = vmatpush1.bf16.msra.mxu0 %v4500_v42  ;;  %v4643_v41 = vld [vmem:[%s6025_s1 + $0x70] ss:$8 sps:$4 sm:$0xff]   ;;  %v4644_v42 = vld [vmem:[%s6025_s1 + $0x84] ss:$8 sps:$4 sm:$0xff]  }
  0x60   : > { %2013 = vmatprep.subr.bf16.mxu0 %v4508_v43  ;;  %1636 = vmatpush1.bf16.msra.mxu1 %v4643_v41  ;;  %v4646_v43 = vld [vmem:[%s6025_s1 + $0x80] ss:$8 sps:$4 sm:$0xff]  }
  0x61   : > { %1637 = vmatprep.subr.bf16.mxu1 %v4644_v42  ;;  %v4620_v38 = vld [vmem:[%s5004_s14 + $0x20c] ss:$28 sps:$4 sm:$0xff]   ;;  %v4629_v42 = vld [vmem:[%s5004_s14 + $0x244] ss:$28 sps:$4 sm:$0xff]  }
  0x62   : > { %v4624_v41 = vld [vmem:[%s5004_s14 + $0x208] ss:$28 sps:$4 sm:$0xff]  }
  0x63   : > { %2014 = vmatpush1.bf16.msra.mxu0 %v4506_v44  ;;  %v4649_v44 = vld [vmem:[%s6025_s1 + $0x94] ss:$8 sps:$4 sm:$0xff]  }
  0x64   : > { %2015 = vmatprep.subr.bf16.mxu0 %v4514_v45  ;;  %v4559_v45 = vld [vmem:[%s5004_s14 + $0x2a8] ss:$28 sps:$4 sm:$0xff]   ;;  %1638 = vmatpush1.bf16.msra.mxu1 %v4646_v43  ;;  %v4720_v43 = vld [vmem:[%s5004_s14 + $0x234] ss:$28 sps:$4 sm:$0xff]  }
  0x65   : > { %1639 = vmatprep.subr.bf16.mxu1 %v4649_v44  ;;  %v4722_v44 = vld [vmem:[%s5004_s14 + $0x230] ss:$28 sps:$4 sm:$0xff]  }
  0x66   : > { %1867 = vmatmul.mubr.bf16.gmra.mrb[8].mxu0 %v4499_v46  ;;  %v4563_v46 = vld [vmem:[%s5004_s14 + $0x2e4] ss:$28 sps:$4 sm:$0xff]  }
  0x67   : > { %1876 = vmatprep.mubr.bf16.mxu0 %v4503_v47  ;;  %2016 = vmatpush1.bf16.msra.mxu0 %v4512_v48  ;;  %v4652_v47 = vld [vmem:[%s6025_s1 + $0x90] ss:$8 sps:$4 sm:$0xff]   ;;  %v4653_v48 = vld [vmem:[%s6025_s1 + $0xa4] ss:$8 sps:$4 sm:$0xff]  }
  0x68   : > { %2017 = vmatprep.subr.bf16.mxu0 %v4520_v49  ;;  %1640 = vmatpush1.bf16.msra.mxu1 %v4652_v47  ;;  %v4655_v49 = vld [vmem:[%s6025_s1 + $0xa0] ss:$8 sps:$4 sm:$0xff]  }
  0x69   : > { %1641 = vmatprep.subr.bf16.mxu1 %v4653_v48  ;;  %v4724_v47 = vld [vmem:[%s5004_s14 + $0x26c] ss:$28 sps:$4 sm:$0xff]  }
  0x6a   : > { %v4726_v48 = vld [vmem:[%s5004_s14 + $0x268] ss:$28 sps:$4 sm:$0xff]  }
  0x6b   : > { %2018 = vmatpush1.bf16.msra.mxu0 %v4518_v50  ;;  %v4658_v50 = vld [vmem:[%s6025_s1 + $0xb4] ss:$8 sps:$4 sm:$0xff]  }
  0x6c   : > { %2019 = vmatprep.subr.bf16.mxu0 %v4526_v51  ;;  %v4565_v51 = vld [vmem:[%s5004_s14 + $0x2e0] ss:$28 sps:$4 sm:$0xff]   ;;  %1642 = vmatpush1.bf16.msra.mxu1 %v4655_v49  ;;  %v4642_v49 = vld [vmem:[%s5004_s14 + $0x278] ss:$28 sps:$4 sm:$0xff]  }
  0x6d   : > { %1643 = vmatprep.subr.bf16.mxu1 %v4658_v50  ;;  %v4647_v50 = vld [vmem:[%s5004_s14 + $0x2b4] ss:$28 sps:$4 sm:$0xff]  }
  0x6e   : > { %1877 = vmatmul.mubr.bf16.gmra.mrb[12].mxu0 %v4505_v52  ;;  %v4569_v52 = vld [vmem:[%s5004_s14 + $0x31c] ss:$28 sps:$4 sm:$0xff]  }
  0x6f   : > { %1886 = vmatprep.mubr.bf16.mxu0 %v4509_v53  ;;  %2020 = vmatpush1.bf16.msra.mxu0 %v4524_v54  ;;  %v4661_v53 = vld [vmem:[%s6025_s1 + $0xb0] ss:$8 sps:$4 sm:$0xff]   ;;  %v4662_v54 = vld [vmem:[%s6025_s1 + $0xc4] ss:$8 sps:$4 sm:$0xff]  }
  0x70   : > { %2021 = vmatprep.subr.bf16.mxu0 %v4532_v55  ;;  %1644 = vmatpush1.bf16.msra.mxu1 %v4661_v53  ;;  %v4664_v55 = vld [vmem:[%s6025_s1 + $0xc0] ss:$8 sps:$4 sm:$0xff]  }
  0x71   : > { %1645 = vmatprep.subr.bf16.mxu1 %v4662_v54  ;;  %v4731_v53 = vld [vmem:[%s6027_s3] ss:$8 sps:$4 sm:$0xff]   ;;  %v4733_v54 = vld [vmem:[%s6027_s3 + $0x4] ss:$8 sps:$4 sm:$0xff]  }
  0x73   : > { %2022 = vmatpush1.bf16.msra.mxu0 %v4530_v56  ;;  %v4667_v56 = vld [vmem:[%s6025_s1 + $0xd4] ss:$8 sps:$4 sm:$0xff]  }
  0x74   : > { %2023 = vmatprep.subr.bf16.mxu0 %v4538_v57  ;;  %v4571_v57 = vld [vmem:[%s5004_s14 + $0x318] ss:$28 sps:$4 sm:$0xff]   ;;  %1646 = vmatpush1.bf16.msra.mxu1 %v4664_v55  ;;  %v4651_v55 = vld [vmem:[%s5004_s14 + $0x2b0] ss:$28 sps:$4 sm:$0xff]  }
  0x75   : > { %1647 = vmatprep.subr.bf16.mxu1 %v4667_v56  ;;  %v4656_v56 = vld [vmem:[%s5004_s14 + $0x2ec] ss:$28 sps:$4 sm:$0xff]  }
  0x76   : > { %1887 = vmatmul.mubr.bf16.gmra.mrb[16].mxu0 %v4511_v58  ;;  %v4575_v58 = vld [vmem:[%s5004_s14 + $0x354] ss:$28 sps:$4 sm:$0xff]  }
  0x77   : > { %1896 = vmatprep.mubr.bf16.mxu0 %v4515_v59  ;;  %2024 = vmatpush1.bf16.msra.mxu0 %v4536_v60  ;;  %v4670_v59 = vld [vmem:[%s6025_s1 + $0xd0] ss:$8 sps:$4 sm:$0xff]   ;;  %v4671_v60 = vld [vmem:[%s6025_s1 + $0xe4] ss:$8 sps:$4 sm:$0xff]  }
  0x78   : > { %2025 = vmatprep.subr.bf16.mxu0 %v4544_v61  ;;  %1648 = vmatpush1.bf16.msra.mxu1 %v4670_v59  ;;  %v4673_v61 = vld [vmem:[%s6025_s1 + $0xe0] ss:$8 sps:$4 sm:$0xff]   ;;  %v4738_v59 = vld [vmem:[%s6027_s3 + $0x10] ss:$8 sps:$4 sm:$0xff]  }
  0x79   : > { %1649 = vmatprep.subr.bf16.mxu1 %v4671_v60  ;;  %v4740_v60 = vld [vmem:[%s6027_s3 + $0x14] ss:$8 sps:$4 sm:$0xff]  }
  0x7b   : > { %2026 = vmatpush1.bf16.msra.mxu0 %v4542_v62  ;;  %v4676_v62 = vld [vmem:[%s6025_s1 + $0xf4] ss:$8 sps:$4 sm:$0xff]  }
  0x7c   : > { %2027 = vmatprep.subr.bf16.mxu0 %v4550_v63  ;;  %v4577_v63 = vld [vmem:[%s5004_s14 + $0x350] ss:$28 sps:$4 sm:$0xff]   ;;  %1650 = vmatpush1.bf16.msra.mxu1 %v4673_v61  ;;  %v4660_v61 = vld [vmem:[%s5004_s14 + $0x2e8] ss:$28 sps:$4 sm:$0xff]  }
  0x7d   : > { %1651 = vmatprep.subr.bf16.mxu1 %v4676_v62  ;;  %v4665_v62 = vld [vmem:[%s5004_s14 + $0x324] ss:$28 sps:$4 sm:$0xff]  }
  0x7e   : > { %1897 = vmatmul.mubr.bf16.gmra.mrb[20].mxu0 %v4517_v0  ;;  %v4583_v0 = vld [vmem:[%s5004_s14 + $0x14] ss:$28 sps:$4 sm:$0xff]  }
  0x7f   : > { %1906 = vmatprep.mubr.bf16.mxu0 %v4521_v1  ;;  %2028 = vmatpush1.bf16.msra.mxu0 %v4548_v2  ;;  %v4679_v1 = vld [vmem:[%s6025_s1 + $0xf0] ss:$8 sps:$4 sm:$0xff]   ;;  %v4680_v2 = vld [vmem:[%s5004_s14] ss:$28 sps:$4 sm:$0xff]  }
  0x80   : > { %2029 = vmatprep.subr.bf16.mxu0 %v4556_v3  ;;  %1652 = vmatpush1.bf16.msra.mxu1 %v4679_v1  ;;  %v4682_v3 = vld [vmem:[%s5004_s14 + $0x4] ss:$28 sps:$4 sm:$0xff]  }
  0x81   : > { %1653 = vmatprep.mubr.bf16.mxu1 %v4682_v3  ;;  %2821 = vmatprep.subr.bf16.mxu1 %v4733_v54  ;;  %v4745_v1 = vld [vmem:[%s6027_s3 + $0x20] ss:$8 sps:$4 sm:$0xff]   ;;  %v4789_v54 = vld [vmem:[%s6027_s3 + $0xf0] ss:$8 sps:$4 sm:$0xff]  }
  0x82   : > { %v4669_v3 = vld [vmem:[%s5004_s14 + $0x320] ss:$28 sps:$4 sm:$0xff]  }
  0x83   : > { %2030 = vmatpush1.bf16.msra.mxu0 %v4554_v4  ;;  %1654 = vmatmul.mubr.bf16.vlgmr.msra.gmra.mrb[0].mxu1 %v4680_v2  ;;  %v4581_v4 = vld [vmem:[%s5004_s14 + $0x10] ss:$28 sps:$4 sm:$0xff]  }
  0x84   : > { %2031 = vmatprep.subr.bf16.mxu0 %v4562_v5  ;;  %v4584_v5 = vld [vmem:[%s6025_s1 + $0x300] ss:$8 sps:$4 sm:$0xff]   ;;  %2822 = vmatpush1.bf16.msra.mxu1 %v4731_v53  ;;  %v4747_v2 = vld [vmem:[%s6027_s3 + $0x24] ss:$8 sps:$4 sm:$0xff]  }
  0x85   : > { %2823 = vmatprep.subr.bf16.mxu1 %v4740_v60  ;;  %v4741_v60 = vld [vmem:[%s5004_s14 + $0x2f0] ss:$28 sps:$4 sm:$0xff]  }
  0x86   : > { %1907 = vmatmul.mubr.bf16.gmra.mrb[24].mxu0 %v4523_v6  ;;  %v4587_v6 = vld [vmem:[%s5004_s14 + $0x4c] ss:$28 sps:$4 sm:$0xff]  }
  0x87   : > { %1916 = vmatprep.mubr.bf16.mxu0 %v4527_v7  ;;  %2032 = vmatpush1.bf16.msra.mxu0 %v4560_v8  ;;  %v4684_v7 = vld [vmem:[%s5004_s14 + $0x3c] ss:$28 sps:$4 sm:$0xff]  }
  0x88   : > { %2033 = vmatprep.subr.bf16.mxu0 %v4568_v9  ;;  %v4686_v8 = vld [vmem:[%s5004_s14 + $0x38] ss:$28 sps:$4 sm:$0xff]   ;;  %1663 = vmatprep.mubr.bf16.mxu1 %v4684_v7  ;;  %v4589_v9 = vld [vmem:[%s5004_s14 + $0x48] ss:$28 sps:$4 sm:$0xff]  }
  0x89   : > { %2824 = vmatpush1.bf16.msra.mxu1 %v4738_v59  ;;  %v4752_v7 = vld [vmem:[%s6027_s3 + $0x30] ss:$8 sps:$4 sm:$0xff]  }
  0x8a   : > { %2825 = vmatprep.subr.bf16.mxu1 %v4747_v2 }
  0x8b   : > { %2034 = vmatpush1.bf16.msra.mxu0 %v4566_v10  ;;  %1664 = vmatmul.mubr.bf16.gmra.mrb[4].mxu1 %v4686_v8  ;;  %v4590_v10 = vld [vmem:[%s5004_s14 + $0x84] ss:$28 sps:$4 sm:$0xff]   ;;  %v4754_v8 = vld [vmem:[%s6027_s3 + $0x34] ss:$8 sps:$4 sm:$0xff]  }
  0x8c   : > { %2035 = vmatprep.subr.bf16.mxu0 %v4574_v11  ;;  %v4688_v11 = vld [vmem:[%s5004_s14 + $0x74] ss:$28 sps:$4 sm:$0xff]  }
  0x8d   : > { %1673 = vmatprep.mubr.bf16.mxu1 %v4688_v11  ;;  %2826 = vmatpush1.bf16.msra.mxu1 %v4745_v1  ;;  %v4758_v11 = vld [vmem:[%s6027_s3 + $0x44] ss:$8 sps:$4 sm:$0xff]  }
  0x8e   : > { %1917 = vmatmul.mubr.bf16.gmra.mrb[28].mxu0 %v4529_v12  ;;  %v4690_v12 = vld [vmem:[%s5004_s14 + $0x70] ss:$28 sps:$4 sm:$0xff]   ;;  %2827 = vmatprep.subr.bf16.mxu1 %v4754_v8  ;;  %v4748_v1 = vld [vmem:[%s5004_s14 + $0x328] ss:$28 sps:$4 sm:$0xff]  }
  0x8f   : > { %1926 = vmatprep.mubr.bf16.mxu0 %v4533_v13  ;;  %2036 = vmatpush1.bf16.msra.mxu0 %v4572_v14  ;;  %v4592_v13 = vld [vmem:[%s5004_s14 + $0x80] ss:$28 sps:$4 sm:$0xff]  }
  0x90   : > { %2037 = vmatprep.subr.bf16.mxu0 %v4580_v15  ;;  %v4593_v14 = vld [vmem:[%s5004_s14 + $0xbc] ss:$28 sps:$4 sm:$0xff]   ;;  %v4692_v15 = vld [vmem:[%s5004_s14 + $0xac] ss:$28 sps:$4 sm:$0xff]  }
  0x91   : > { %2828 = vmatpush1.bf16.msra.mxu1 %v4752_v7 }
  0x92   : > { %2829 = vmatprep.subr.bf16.mxu1 %v4758_v11 }
  0x93   : > { %2038 = vmatpush1.bf16.msra.mxu0 %v4578_v16  ;;  %1674 = vmatmul.mubr.bf16.gmra.mrb[8].mxu1 %v4690_v12  ;;  %v4694_v16 = vld [vmem:[%s5004_s14 + $0xa8] ss:$28 sps:$4 sm:$0xff]   ;;  %v4872_v12 = vmov 0  }
  0x94   : > { %2200 = vmatprep.subr.bf16.mxu0 %v4586_v19  ;;  %1683 = vmatprep.mubr.bf16.mxu1 %v4692_v15  ;;  %v4696_v19 = vld [vmem:[%s5004_s14 + $0xe4] ss:$28 sps:$4 sm:$0xff]   ;;  %v4683_v15 = vld [vmem:[%s5004_s14 + $0x18] ss:$28 sps:$4 sm:$0xff]  }
  0x96   : > { %1927 = vmatmul.mubr.bf16.gmra.mrb[32].mxu0 %v4535_v21  ;;  %v4598_v21 = vld [vmem:[%s5004_s14 + $0xf0] ss:$28 sps:$4 sm:$0xff]  }
  0x97   : > { %1936 = vmatprep.mubr.bf16.mxu0 %v4539_v22  ;;  %v4599_v22 = vld [vmem:[%s5004_s14 + $0x12c] ss:$28 sps:$4 sm:$0xff]  }
  0x9b   : > { %1684 = vmatmul.mubr.bf16.gmra.mrb[12].mxu1 %v4694_v16  ;;  %v4764_v16 = vld [vmem:[%s6027_s3 + $0x64] ss:$8 sps:$4 sm:$0xff]  }
  0x9c   : > { %1693 = vmatprep.mubr.bf16.mxu1 %v4696_v19  ;;  %v4765_v19 = vld [vmem:[%s6027_s3 + $0x70] ss:$8 sps:$4 sm:$0xff]  }
  0x9e   : > { %1937 = vmatmul.mubr.bf16.gmra.mrb[36].mxu0 %v4541_v27  ;;  %v4704_v27 = vld [vmem:[%s5004_s14 + $0x154] ss:$28 sps:$4 sm:$0xff]  }
  0x9f   : > { %1946 = vmatprep.mubr.bf16.mxu0 %v4545_v28  ;;  %v4706_v28 = vld [vmem:[%s5004_s14 + $0x150] ss:$28 sps:$4 sm:$0xff]  }
  0xa3   : > { %1694 = vmatmul.mubr.bf16.gmra.mrb[16].mxu1 %v4698_v20  ;;  %v4687_v20 = vld [vmem:[%s5004_s14 + $0x50] ss:$28 sps:$4 sm:$0xff]  }
  0xa4   : > { %1703 = vmatprep.mubr.bf16.mxu1 %v4700_v23  ;;  %v4773_v23 = vld [vmem:[%s6027_s3 + $0x94] ss:$8 sps:$4 sm:$0xff]  }
  0xa6   : > { %1947 = vmatmul.mubr.bf16.gmra.mrb[40].mxu0 %v4547_v33  ;;  %v4607_v33 = vld [vmem:[%s5004_s14 + $0x198] ss:$28 sps:$4 sm:$0xff]  }
  0xa7   : > { %1956 = vmatprep.mubr.bf16.mxu0 %v4551_v34  ;;  %v4611_v34 = vld [vmem:[%s5004_s14 + $0x1d4] ss:$28 sps:$4 sm:$0xff]  }
  0xab   : > { %1704 = vmatmul.mubr.bf16.gmra.mrb[20].mxu1 %v4702_v24  ;;  %v4771_v24 = vld [vmem:[%s6027_s3 + $0x90] ss:$8 sps:$4 sm:$0xff]  }
  0xac   : > { %1713 = vmatprep.mubr.bf16.mxu1 %v4704_v27  ;;  %v4774_v27 = vld [vmem:[%s6027_s3 + $0xa0] ss:$8 sps:$4 sm:$0xff]  }
  0xae   : > { %1957 = vmatmul.mubr.bf16.gmra.mrb[44].mxu0 %v4553_v39  ;;  %v4716_v39 = vld [vmem:[%s5004_s14 + $0x1fc] ss:$28 sps:$4 sm:$0xff]  }
  0xaf   : > { %1966 = vmatprep.mubr.bf16.mxu0 %v4557_v40  ;;  %v4718_v40 = vld [vmem:[%s5004_s14 + $0x1f8] ss:$28 sps:$4 sm:$0xff]  }
  0xb3   : > { %1714 = vmatmul.mubr.bf16.gmra.mrb[24].mxu1 %v4706_v28  ;;  %v4779_v28 = vld [vmem:[%s6027_s3 + $0xb4] ss:$8 sps:$4 sm:$0xff]  }
  0xb4   : > { %1723 = vmatprep.mubr.bf16.mxu1 %v4708_v31  ;;  %v4782_v31 = vld [vmem:[%s6027_s3 + $0xc4] ss:$8 sps:$4 sm:$0xff]  }
  0xb6   : > { %1967 = vmatmul.mubr.bf16.gmra.mrb[48].mxu0 %v4559_v45  ;;  %v4633_v45 = vld [vmem:[%s5004_s14 + $0x240] ss:$28 sps:$4 sm:$0xff]  }
  0xb7   : > { %1976 = vmatprep.mubr.bf16.mxu0 %v4563_v46  ;;  %v4638_v46 = vld [vmem:[%s5004_s14 + $0x27c] ss:$28 sps:$4 sm:$0xff]  }
  0xbb   : > { %1724 = vmatmul.mubr.bf16.gmra.mrb[28].mxu1 %v4710_v32  ;;  %v4780_v32 = vld [vmem:[%s6027_s3 + $0xc0] ss:$8 sps:$4 sm:$0xff]  }
  0xbc   : > { %1733 = vmatprep.mubr.bf16.mxu1 %v4712_v35  ;;  %v4699_v35 = vld [vmem:[%s5004_s14 + $0xf8] ss:$28 sps:$4 sm:$0xff]  }
  0xbe   : > { %1977 = vmatmul.mubr.bf16.gmra.mrb[52].mxu0 %v4565_v51  ;;  %v4728_v51 = vld [vmem:[%s5004_s14 + $0x2a4] ss:$28 sps:$4 sm:$0xff]  }
  0xbf   : > { %1986 = vmatprep.mubr.bf16.mxu0 %v4569_v52  ;;  %v4730_v52 = vld [vmem:[%s5004_s14 + $0x2a0] ss:$28 sps:$4 sm:$0xff]  }
  0xc3   : > { %1734 = vmatmul.mubr.bf16.gmra.mrb[32].mxu1 %v4714_v36  ;;  %v4788_v36 = vld [vmem:[%s6027_s3 + $0xe4] ss:$8 sps:$4 sm:$0xff]  }
  0xc4   : > { %1743 = vmatprep.mubr.bf16.mxu1 %v4716_v39  ;;  %v4707_v39 = vld [vmem:[%s5004_s14 + $0x168] ss:$28 sps:$4 sm:$0xff]  }
  0xc6   : > { %1987 = vmatmul.mubr.bf16.gmra.mrb[56].mxu0 %v4571_v57  ;;  %v4735_v57 = vld [vmem:[%s5004_s14 + $0x2dc] ss:$28 sps:$4 sm:$0xff]  }
  0xc7   : > { %1996 = vmatprep.mubr.bf16.mxu0 %v4575_v58  ;;  %v4737_v58 = vld [vmem:[%s5004_s14 + $0x2d8] ss:$28 sps:$4 sm:$0xff]  }
  0xcb   : > { %1744 = vmatmul.mubr.bf16.gmra.mrb[36].mxu1 %v4718_v40  ;;  %v4711_v40 = vld [vmem:[%s5004_s14 + $0x1a0] ss:$28 sps:$4 sm:$0xff]  }
  0xcc   : > { %1753 = vmatprep.mubr.bf16.mxu1 %v4720_v43  ;;  %v4723_v43 = vld [vmem:[%s5004_s14 + $0x248] ss:$28 sps:$4 sm:$0xff]  }
  0xce   : > { %1997 = vmatmul.mubr.bf16.gmra.mrb[60].mxu0 %v4577_v63  ;;  %v4742_v63 = vld [vmem:[%s5004_s14 + $0x314] ss:$28 sps:$4 sm:$0xff]  }
  0xcf   : > { %2039 = vmatprep.mubr.bf16.mxu0 %v4583_v0  ;;  %v4744_v0 = vld [vmem:[%s5004_s14 + $0x310] ss:$28 sps:$4 sm:$0xff]  }
  0xd3   : > { %1754 = vmatmul.mubr.bf16.gmra.mrb[40].mxu1 %v4722_v44 }
  0xd4   : > { %1763 = vmatprep.mubr.bf16.mxu1 %v4724_v47 }
  0xd6   : > { %2040 = vmatmul.mubr.bf16.vlgmr.msra.gmra.mrb[0].mxu0 %v4581_v4  ;;  %v4674_v4 = vld [vmem:[%s5004_s14 + $0x35c] ss:$28 sps:$4 sm:$0xff]  }
  0xd7   : > { %2201 = vmatpush1.bf16.msra.mxu0 %v4584_v5  ;;  %2049 = vmatprep.mubr.bf16.mxu0 %v4587_v6  ;;  %v4749_v5 = vld [vmem:[%s5004_s14 + $0x34c] ss:$28 sps:$4 sm:$0xff]  }
  0xd8   : > { %v4751_v6 = vld [vmem:[%s5004_s14 + $0x348] ss:$28 sps:$4 sm:$0xff]  }
  0xdb   : > { %1764 = vmatmul.mubr.bf16.gmra.mrb[44].mxu1 %v4726_v48  ;;  %v4727_v48 = vld [vmem:[%s5004_s14 + $0x280] ss:$28 sps:$4 sm:$0xff]  }
  0xdc   : > { %1773 = vmatprep.mubr.bf16.mxu1 %v4728_v51 }
  0xde   : > { %2050 = vmatmul.mubr.bf16.gmra.mrb[4].mxu0 %v4589_v9  ;;  %v4678_v9 = vld [vmem:[%s5004_s14 + $0x358] ss:$28 sps:$4 sm:$0xff]  }
  0xdf   : > { %2059 = vmatprep.mubr.bf16.mxu0 %v4590_v10  ;;  %v4756_v10 = vld [vmem:[%s6027_s3 + $0x40] ss:$8 sps:$4 sm:$0xff]  }
  0xe0   : > { %2830 = vmatpush1.bf16.msra.mxu1 %v4756_v10 }
  0xe3   : > { %1774 = vmatmul.mubr.bf16.gmra.mrb[48].mxu1 %v4730_v52  ;;  %v4791_v52 = vld [vmem:[%s6027_s3 + $0xf4] ss:$8 sps:$4 sm:$0xff]  }
  0xe4   : > { %1783 = vmatprep.mubr.bf16.mxu1 %v4735_v57 }
  0xe6   : > { %2060 = vmatmul.mubr.bf16.gmra.mrb[8].mxu0 %v4592_v13  ;;  %v4761_v13 = vld [vmem:[%s6027_s3 + $0x54] ss:$8 sps:$4 sm:$0xff]  }
  0xe7   : > { %2069 = vmatprep.mubr.bf16.mxu0 %v4593_v14  ;;  %v4759_v14 = vld [vmem:[%s6027_s3 + $0x50] ss:$8 sps:$4 sm:$0xff]   ;;  %2831 = vmatprep.subr.bf16.mxu1 %v4761_v13 }
  0xe8   : > { %2832 = vmatpush1.bf16.msra.mxu1 %v4759_v14 }
  0xe9   : > { %2833 = vmatprep.subr.bf16.mxu1 %v4764_v16 }
  0xeb   : > { %1784 = vmatmul.mubr.bf16.gmra.mrb[52].mxu1 %v4737_v58 }
  0xec   : > { %1793 = vmatprep.mubr.bf16.mxu1 %v4742_v63 }
  0xee   : > { %2070 = vmatmul.mubr.bf16.gmra.mrb[12].mxu0 %v4595_v17  ;;  %v4762_v17 = vld [vmem:[%s6027_s3 + $0x60] ss:$8 sps:$4 sm:$0xff]  }
  0xef   : > { %2079 = vmatprep.mubr.bf16.mxu0 %v4596_v18  ;;  %v4767_v18 = vld [vmem:[%s6027_s3 + $0x74] ss:$8 sps:$4 sm:$0xff]   ;;  %2834 = vmatpush1.bf16.msra.mxu1 %v4762_v17 }
  0xf0   : > { %2835 = vmatprep.subr.bf16.mxu1 %v4767_v18 }
  0xf3   : > { %1794 = vmatmul.mubr.bf16.gmra.mrb[56].mxu1 %v4744_v0 }
  0xf4   : > { %1803 = vmatprep.mubr.bf16.mxu1 %v4749_v5  ;;  %2836 = vmatpush1.bf16.msra.mxu1 %v4765_v19 }
  0xf6   : > { %2080 = vmatmul.mubr.bf16.gmra.mrb[16].mxu0 %v4598_v21  ;;  %v4770_v21 = vld [vmem:[%s6027_s3 + $0x84] ss:$8 sps:$4 sm:$0xff]  }
  0xf7   : > { %2089 = vmatprep.mubr.bf16.mxu0 %v4599_v22  ;;  %v4768_v22 = vld [vmem:[%s6027_s3 + $0x80] ss:$8 sps:$4 sm:$0xff]   ;;  %2837 = vmatprep.subr.bf16.mxu1 %v4770_v21 }
  0xf8   : > { %2838 = vmatpush1.bf16.msra.mxu1 %v4768_v22 }
  0xf9   : > { %2839 = vmatprep.subr.bf16.mxu1 %v4773_v23 }
  0xfb   : > { %1804 = vmatmul.mubr.bf16.gmra.mrb[60].mxu1 %v4751_v6  ;;  %v4755_v6 = vld [vmem:[%s5004_s14 + $0x360] ss:$28 sps:$4 sm:$0xff]  }
  0xfc   : > { %2840 = vmatpush1.bf16.msra.mxu1 %v4771_v24 }
  0xfe   : > { %2090 = vmatmul.mubr.bf16.gmra.mrb[20].mxu0 %v4601_v25  ;;  %v4691_v25 = vld [vmem:[%s5004_s14 + $0x88] ss:$28 sps:$4 sm:$0xff]  }
  0xff   : > { %2099 = vmatprep.mubr.bf16.mxu0 %v4602_v26  ;;  %v4776_v26 = vld [vmem:[%s6027_s3 + $0xa4] ss:$8 sps:$4 sm:$0xff]  }
 0x100   : > { %2841 = vmatprep.subr.bf16.mxu1 %v4776_v26 }
 0x101   : > { %2842 = vmatpush1.bf16.msra.mxu1 %v4774_v27 }
 0x102   : > { %2843 = vmatprep.subr.bf16.mxu1 %v4779_v28 }
 0x106   : > { %2100 = vmatmul.mubr.bf16.gmra.mrb[24].mxu0 %v4604_v29  ;;  %v4777_v29 = vld [vmem:[%s6027_s3 + $0xb0] ss:$8 sps:$4 sm:$0xff]  }
 0x107   : > { %2109 = vmatprep.mubr.bf16.mxu0 %v4605_v30  ;;  %v4695_v30 = vld [vmem:[%s5004_s14 + $0xc0] ss:$28 sps:$4 sm:$0xff]   ;;  %2844 = vmatpush1.bf16.msra.mxu1 %v4777_v29 }
 0x108   : > { %2845 = vmatprep.subr.bf16.mxu1 %v4782_v31 }
 0x10b   : > { %2846 = vmatpush1.bf16.msra.mxu1 %v4780_v32 }
 0x10e   : > { %2110 = vmatmul.mubr.bf16.gmra.mrb[28].mxu0 %v4607_v33  ;;  %v4785_v33 = vld [vmem:[%s6027_s3 + $0xd4] ss:$8 sps:$4 sm:$0xff]  }
 0x10f   : > { %2119 = vmatprep.mubr.bf16.mxu0 %v4611_v34  ;;  %v4783_v34 = vld [vmem:[%s6027_s3 + $0xd0] ss:$8 sps:$4 sm:$0xff]   ;;  %2847 = vmatprep.subr.bf16.mxu1 %v4785_v33 }
 0x110   : > { %2848 = vmatpush1.bf16.msra.mxu1 %v4783_v34 }
 0x111   : > { %2849 = vmatprep.subr.bf16.mxu1 %v4788_v36 }
 0x116   : > { %2120 = vmatmul.mubr.bf16.gmra.mrb[32].mxu0 %v4615_v37  ;;  %v4786_v37 = vld [vmem:[%s6027_s3 + $0xe0] ss:$8 sps:$4 sm:$0xff]  }
 0x117   : > { %2129 = vmatprep.mubr.bf16.mxu0 %v4620_v38  ;;  %2850 = vmatpush1.bf16.msra.mxu1 %v4786_v37  ;;  %v4703_v38 = vld [vmem:[%s5004_s14 + $0x130] ss:$28 sps:$4 sm:$0xff]  }
 0x118   : > { %2851 = vmatprep.subr.bf16.mxu1 %v4791_v52  ;;  %v512_v52 = vlaneseq }
 0x11b   : > { %2852 = vmatpush1.bf16.msra.mxu1 %v4789_v54 }
 0x11e   : > { %2130 = vmatmul.mubr.bf16.gmra.mrb[36].mxu0 %v4624_v41  ;;  %v4715_v41 = vld [vmem:[%s5004_s14 + $0x1d8] ss:$28 sps:$4 sm:$0xff]  }
 0x11f   : > { %2139 = vmatprep.mubr.bf16.mxu0 %v4629_v42  ;;  %v4719_v42 = vld [vmem:[%s5004_s14 + $0x210] ss:$28 sps:$4 sm:$0xff]  }
 0x126   : > { %2140 = vmatmul.mubr.bf16.gmra.mrb[40].mxu0 %v4633_v45 }
 0x127   : > { %2149 = vmatprep.mubr.bf16.mxu0 %v4638_v46 }
 0x12e   : > { %2150 = vmatmul.mubr.bf16.gmra.mrb[44].mxu0 %v4642_v49 }
 0x12f   : > { %2159 = vmatprep.mubr.bf16.mxu0 %v4647_v50 }
 0x136   : > { %2160 = vmatmul.mubr.bf16.gmra.mrb[48].mxu0 %v4651_v55  ;;  %v4734_v55 = vld [vmem:[%s5004_s14 + $0x2b8] ss:$28 sps:$4 sm:$0xff]   ;;  %s3676_s14 = sshll.u32 %s5908_s15, 4  ;;  %s5977_s14 = int_to_ptr.vmem [resolvable:$true] %s3676_s14 }
 0x137   : > { %2169 = vmatprep.mubr.bf16.mxu0 %v4656_v56  ;;  %s4808_s19 = scalar_lea.vmem %s5977_s14, 4096  ;;  %p4815_p0 = scmp.lt.s32.totalorder %s5977_s14, %s4813_s21 }
 0x138   : > { %p4809_p11 = scmp.ne.s32.totalorder %s5977_s14, %s4808_s19  ;;  %p4816_p1 = scmp.lt.s32.totalorder %s4814_s22, %s4808_s19 }
 0x13a   : > { %p4810_p12 = pnand %p4809_p11, %p4954_p5  ;;  %p4817_p2 = por %p4816_p1, %p4815_p0 }
 0x13c   : > { %p4811_p13 = pneg %p4810_p12 }
 0x13e   : > { %2170 = vmatmul.mubr.bf16.gmra.mrb[52].mxu0 %v4660_v61  ;;  %p4818_p3 = pnand %p4817_p2, %p4811_p13 }
 0x13f   : > { %2179 = vmatprep.mubr.bf16.mxu0 %v4665_v62 }
 0x146   : > { %2180 = vmatmul.mubr.bf16.gmra.mrb[56].mxu0 %v4669_v3 }
 0x147   : > { %2189 = vmatprep.mubr.bf16.mxu0 %v4674_v4 }
 0x14e   : > { %2190 = vmatmul.mubr.bf16.gmra.mrb[60].mxu0 %v4678_v9 }
 0x14f   : > { %2232 = vmatprep.mubr.bf16.mxu0 %v4872_v12 }
 0x156   : > { %3955 = vmatmul.mubr.msk.bf16.vlgmr.msra.gmra.mrb[0].mxu0 %vm1572_vm0, %v4683_v15  ;;  %v5482_v44 = vpop.f32.mrb[0].mxu1 }
 0x157   : > { %2242 = vmatprep.mubr.bf16.mxu0 %v4872_v12  ;;  %v5484_v45 = vpop.f32.mrb[1].mxu1 }
 0x158   : > { %v5487_v46 = vpop.f32.mrb[2].mxu1 }
 0x159   : > { %v5490_v47 = vpop.f32.mrb[3].mxu1 }
 0x15e   : > { %3956 = vmatmul.mubr.msk.bf16.gmra.mrb[4].mxu0 %vm1572_vm0, %v4687_v20  ;;  %v5493_v49 = vpop.f32.mrb[4].mxu1 }
 0x15f   : > { %2252 = vmatprep.mubr.bf16.mxu0 %v4872_v12  ;;  %v5495_v50 = vpop.f32.mrb[5].mxu1 }
 0x160   : > { %v5498_v51 = vpop.f32.mrb[6].mxu1 }
 0x161   : > { %v5504_v53 = vpop.f32.mrb[7].mxu1 }
 0x166   : > { %3957 = vmatmul.mubr.msk.bf16.gmra.mrb[8].mxu0 %vm1572_vm0, %v4691_v25  ;;  %v5510_v56 = vpop.f32.mrb[8].mxu1 }
 0x167   : > { %2262 = vmatprep.mubr.bf16.mxu0 %v4872_v12  ;;  %v5512_v57 = vpop.f32.mrb[9].mxu1 }
 0x168   : > { %v5515_v58 = vpop.f32.mrb[10].mxu1 }
 0x169   : > { %v5518_v59 = vpop.f32.mrb[11].mxu1 }
 0x16e   : > { %3958 = vmatmul.mubr.msk.bf16.gmra.mrb[12].mxu0 %vm1572_vm0, %v4695_v30  ;;  %v5521_v61 = vpop.f32.mrb[12].mxu1 }
 0x16f   : > { %2272 = vmatprep.mubr.bf16.mxu0 %v4872_v12  ;;  %v5523_v62 = vpop.f32.mrb[13].mxu1 }
 0x170   : > { %v5526_v63 = vpop.f32.mrb[14].mxu1 }
 0x171   : > { %v5529_v0 = vpop.f32.mrb[15].mxu1 }
 0x176   : > { %3959 = vmatmul.mubr.msk.bf16.gmra.mrb[16].mxu0 %vm1572_vm0, %v4699_v35  ;;  %v5532_v2 = vpop.f32.mrb[16].mxu1 }
 0x177   : > { %2282 = vmatprep.mubr.bf16.mxu0 %v4872_v12  ;;  %v5534_v3 = vpop.f32.mrb[17].mxu1 }
 0x178   : > { %v5537_v4 = vpop.f32.mrb[18].mxu1 }
 0x179   : > { %v5540_v5 = vpop.f32.mrb[19].mxu1 }
 0x17e   : > { %3960 = vmatmul.mubr.msk.bf16.gmra.mrb[20].mxu0 %vm1572_vm0, %v4703_v38  ;;  %v5543_v7 = vpop.f32.mrb[20].mxu1 }
 0x17f   : > { %2292 = vmatprep.mubr.bf16.mxu0 %v4872_v12  ;;  %v5545_v8 = vpop.f32.mrb[21].mxu1 }
 0x180   : > { %v5548_v9 = vpop.f32.mrb[22].mxu1 }
 0x181   : > { %v5550_v10 = vpop.f32.mrb[23].mxu1 }
 0x186   : > { %3961 = vmatmul.mubr.msk.bf16.gmra.mrb[24].mxu0 %vm1572_vm0, %v4707_v39  ;;  %v5552_v11 = vpop.f32.mrb[24].mxu1 }
 0x187   : > { %2302 = vmatprep.mubr.bf16.mxu0 %v4872_v12  ;;  %v5554_v13 = vpop.f32.mrb[25].mxu1 }
 0x188   : > { %v5556_v14 = vpop.f32.mrb[26].mxu1 }
 0x18e   : > { %3962 = vmatmul.mubr.msk.bf16.gmra.mrb[28].mxu0 %vm1572_vm0, %v4711_v40 }
 0x18f   : > { %2312 = vmatprep.mubr.bf16.mxu0 %v4872_v12 }
 0x196   : > { %3963 = vmatmul.mubr.msk.bf16.gmra.mrb[32].mxu0 %vm1572_vm0, %v4715_v41 }
 0x197   : > { %2322 = vmatprep.mubr.bf16.mxu0 %v4872_v12 }
 0x19e   : > { %3964 = vmatmul.mubr.msk.bf16.gmra.mrb[36].mxu0 %vm1572_vm0, %v4719_v42 }
 0x19f   : > { %2332 = vmatprep.mubr.bf16.mxu0 %v4872_v12 }
 0x1a6   : > { %3965 = vmatmul.mubr.msk.bf16.gmra.mrb[40].mxu0 %vm1572_vm0, %v4723_v43 }
 0x1a7   : > { %2342 = vmatprep.mubr.bf16.mxu0 %v4872_v12 }
 0x1ae   : > { %3966 = vmatmul.mubr.msk.bf16.gmra.mrb[44].mxu0 %vm1572_vm0, %v4727_v48 }
 0x1af   : > { %2352 = vmatprep.mubr.bf16.mxu0 %v4872_v12 }
 0x1b6   : > { %3967 = vmatmul.mubr.msk.bf16.gmra.mrb[48].mxu0 %vm1572_vm0, %v4734_v55  ;;  %v4792_v55 = vld [vmem:[%s6029_s5 + $0x40] sm:$0xff]  }
 0x1b7   : > { %2362 = vmatprep.mubr.bf16.mxu0 %v4872_v12  ;;  %4026 = vmatprep.subr.bf16.mxu1 %v4792_v55 }
 0x1be   : > { %3968 = vmatmul.mubr.msk.bf16.gmra.mrb[52].mxu0 %vm1572_vm0, %v4741_v60 }
 0x1bf   : > { %2372 = vmatprep.mubr.bf16.mxu0 %v4872_v12 }
 0x1c6   : > { %3969 = vmatmul.mubr.msk.bf16.gmra.mrb[56].mxu0 %vm1572_vm0, %v4748_v1  ;;  %v5627_v1 = vshrl.u32 %v512_v52, 7 }
 0x1c7   : > { %2382 = vmatprep.mubr.bf16.mxu0 %v4872_v12  ;;  %v5558_v12 = vpop.f32.mrb[27].mxu1 }
 0x1c8   : > { %v5560_v15 = vpop.f32.mrb[28].mxu1  ;;  %6053 = vst [vmem:[#allocation20_spill] sm:$0xff] %v5627_v1 }
 0x1c9   : > { %v5562_v16 = vpop.f32.mrb[29].mxu1 }
 0x1ca   : > { %v5564_v17 = vpop.f32.mrb[30].mxu1 }
 0x1cb   : > { %v5566_v18 = vpop.f32.mrb[31].mxu1 }
 0x1cc   : > { %v5568_v19 = vpop.f32.mrb[32].mxu1 }
 0x1cd   : > { %v5570_v20 = vpop.f32.mrb[33].mxu1 }
 0x1ce   : > { %3970 = vmatmul.mubr.msk.bf16.gmra.mrb[60].mxu0 %vm1572_vm0, %v4755_v6  ;;  %v5572_v21 = vpop.f32.mrb[34].mxu1 }
 0x1cf   : > { %v5574_v22 = vpop.f32.mrb[35].mxu1 }
 0x1d0   : > { %v5576_v23 = vpop.f32.mrb[36].mxu1 }
 0x1d1   : > { %v5578_v24 = vpop.f32.mrb[37].mxu1 }
 0x1d2   : > { %v5580_v25 = vpop.f32.mrb[38].mxu1 }
 0x1d3   : > { %v5582_v26 = vpop.f32.mrb[39].mxu1 }
 0x1d4   : > { %v5584_v27 = vpop.f32.mrb[40].mxu1 }
 0x1d5   : > { %v5586_v28 = vpop.f32.mrb[41].mxu1 }
 0x1d6   : > { %v5588_v29 = vpop.f32.mrb[42].mxu1 }
 0x1d7   : > { %v5590_v30 = vpop.f32.mrb[43].mxu1 }
 0x1d8   : > { %v5592_v31 = vpop.f32.mrb[44].mxu1 }
 0x1d9   : > { %v5594_v32 = vpop.f32.mrb[45].mxu1 }
 0x1da   : > { %6038 = vst [vmem:[#allocation5_spill] sm:$0xff] %v5594_v32  ;;  %v5596_v33 = vpop.f32.mrb[46].mxu1 }
 0x1db   : > { %6039 = vst [vmem:[#allocation6_spill] sm:$0xff] %v5596_v33  ;;  %v5598_v34 = vpop.f32.mrb[47].mxu1 }
 0x1dc   : > { %6040 = vst [vmem:[#allocation7_spill] sm:$0xff] %v5598_v34  ;;  %v5600_v35 = vpop.f32.mrb[48].mxu1 }
 0x1dd   : > { %6041 = vst [vmem:[#allocation8_spill] sm:$0xff] %v5600_v35  ;;  %v5602_v36 = vpop.f32.mrb[49].mxu1 }
 0x1de   : > { %6042 = vst [vmem:[#allocation9_spill] sm:$0xff] %v5602_v36  ;;  %v5604_v37 = vpop.f32.mrb[50].mxu1 }
 0x1df   : > { %6043 = vst [vmem:[#allocation10_spill] sm:$0xff] %v5604_v37  ;;  %v5606_v38 = vpop.f32.mrb[51].mxu1 }
 0x1e0   : > { %6044 = vst [vmem:[#allocation11_spill] sm:$0xff] %v5606_v38  ;;  %v5608_v39 = vpop.f32.mrb[52].mxu1 }
 0x1e1   : > { %6045 = vst [vmem:[#allocation12_spill] sm:$0xff] %v5608_v39  ;;  %v5610_v40 = vpop.f32.mrb[53].mxu1 }
 0x1e2   : > { %6046 = vst [vmem:[#allocation13_spill] sm:$0xff] %v5610_v40  ;;  %v5612_v41 = vpop.f32.mrb[54].mxu1 }
 0x1e3   : > { %6047 = vst [vmem:[#allocation14_spill] sm:$0xff] %v5612_v41  ;;  %v5614_v42 = vpop.f32.mrb[55].mxu1 }
 0x1e4   : > { %6048 = vst [vmem:[#allocation15_spill] sm:$0xff] %v5614_v42  ;;  %v5616_v43 = vpop.f32.mrb[56].mxu1 }
 0x1e5   : > { %6049 = vst [vmem:[#allocation16_spill] sm:$0xff] %v5616_v43  ;;  %v5618_v48 = vpop.f32.mrb[57].mxu1  ;;  %v6032_v43 = vsub.s32 0, %v5627_v1 }
 0x1e6   : > { %6050 = vst [vmem:[#allocation17_spill] sm:$0xff] %v5618_v48  ;;  %v5620_v54 = vpop.f32.mrb[58].mxu1  ;;  %v6035_v48 = vsub.s32 1, %v5627_v1 }
 0x1e7   : > { %6051 = vst [vmem:[#allocation18_spill] sm:$0xff] %v5620_v54  ;;  %v5625_v60 = vpop.f32.mrb[59].mxu1  ;;  %v510_v54 = vld [vmem:[%s6026_s2] sm:$0x3] }
 0x1e8   : > { %6052 = vst [vmem:[#allocation19_spill] sm:$0xff] %v5625_v60  ;;  %v5629_v6 = vpop.f32.mrb[60].mxu1  ;;  %v5644_v52 = vrot.slane %v510_v54, %v6032_v43  ;;  %v5648_v55 = vrot.slane %v510_v54, %v6035_v48 }
 0x1e9   : > { %6054 = vst [vmem:[#allocation21_spill] sm:$0xff] %v5629_v6  ;;  %v5631_v41 = vpop.f32.mrb[61].mxu1 }
 0x1ea   : > { %6055 = vst [vmem:[#allocation22_spill] sm:$0xff] %v5631_v41  ;;  %v5634_v42 = vpop.f32.mrb[62].mxu1  ;;  %v1656_v41 = vadd.f32 %v5482_v44, %v5644_v52  ;;  %v1660_v60 = vadd.f32 %v5487_v46, %v5644_v52  ;;  %v1662_v43 = vadd.f32 %v5490_v47, %v5648_v55  ;;  %v1666_v35 = vadd.f32 %v5493_v49, %v5644_v52  ;;  %v4793_v49 = vld [vmem:[%s6029_s5] sm:$0xff]  }
 0x1eb   : > { %6056 = vst [vmem:[#allocation23_spill] sm:$0xff] %v5634_v42  ;;  %v5640_v40 = vpop.f32.mrb[63].mxu1  ;;  %v1658_v42 = vadd.f32 %v5484_v45, %v5648_v55  ;;  %v1672_v32 = vadd.f32 %v5504_v53, %v5648_v55  ;;  %v1676_v53 = vadd.f32 %v5510_v56, %v5644_v52 }
 0x1ec   : > { %6057 = vst [vmem:[#allocation24_spill] sm:$0xff] %v5640_v40 }
 0x229   : > { %v2234_v6 = vpop.f32.mrb[0].mxu0 }
 0x22a   : > { %v4139_v39 = vadd.f32 %v2234_v6, %v1656_v41  ;;  %v2236_v40 = vpop.f32.mrb[1].mxu0  ;;  %v1668_v41 = vadd.f32 %v5495_v50, %v5648_v55 }
 0x22b   : > { %v4141_v38 = vadd.f32 %v2236_v40, %v1658_v42  ;;  %v2238_v37 = vpop.f32.mrb[2].mxu0 }
 0x22c   : > { %v2457_v1 = vmul.f32 0.01, %v4139_v39  ;;  %v4143_v54 = vadd.f32 %v2238_v37, %v1660_v60  ;;  %v2240_v48 = vpop.f32.mrb[3].mxu0  ;;  %vm2393_vm1 = vcmp.ge.f32.partialorder %v4139_v39, 0.0 }
 0x22d   : > { %v2458_v36 = vmul.f32 0.01, %v4141_v38  ;;  %v4145_v44 = vadd.f32 %v2240_v48, %v1662_v43  ;;  %vm2394_vm2 = vcmp.ge.f32.partialorder %v4141_v38, 0.0  ;;  %v1670_v43 = vadd.f32 %v5498_v51, %v5644_v52 }
 0x22e   : > { %vm2395_vm3 = vcmp.ge.f32.partialorder %v4143_v54, 0.0  ;;  %v2459_v45 = vmul.f32 0.01, %v4143_v54  ;;  %v2521_v47 = vsel %vm2393_vm1, %v4139_v39, %v2457_v1 }
 0x22f   : > { %vm2396_vm4 = vcmp.ge.f32.partialorder %v4145_v44, 0.0  ;;  %v2460_v46 = vmul.f32 0.01, %v4145_v44  ;;  %v2522_v37 = vsel %vm2394_vm2, %v4141_v38, %v2458_v36  ;;  %v4794_v36 = vld [vmem:[%s6029_s5 + $0x48] sm:$0xff]  }
 0x230   : > { %v2523_v40 = vsel %vm2395_vm3, %v4143_v54, %v2459_v45 }
 0x231   : > { %v2585_v42 = vpack.c.bf16 %v2523_v40, %v2521_v47  ;;  %v2244_v6 = vpop.f32.mrb[4].mxu0  ;;  %v2524_v60 = vsel %vm2396_vm4, %v4145_v44, %v2460_v46 }
 0x232   : > { %v4147_v48 = vadd.f32 %v2244_v6, %v1666_v35  ;;  %v2246_v34 = vpop.f32.mrb[5].mxu0  ;;  %v2586_v33 = vpack.c.bf16 %v2524_v60, %v2522_v37  ;;  %v1680_v6 = vadd.f32 %v5515_v58, %v5644_v52 }
 0x233   : > { %v4149_v50 = vadd.f32 %v2246_v34, %v1668_v41  ;;  %v2248_v39 = vpop.f32.mrb[6].mxu0  ;;  %v4795_v34 = vld [vmem:[%s6029_s5 + $0x8] sm:$0xff]  }
 0x234   : > { %v2461_v38 = vmul.f32 0.01, %v4147_v48  ;;  %v4151_v1 = vadd.f32 %v2248_v39, %v1670_v43  ;;  %v2250_v54 = vpop.f32.mrb[7].mxu0  ;;  %2853 = vmatprep.mubr.bf16.mxu1 %v2586_v33  ;;  %vm2397_vm5 = vcmp.ge.f32.partialorder %v4147_v48, 0.0  ;;  %v1678_v33 = vadd.f32 %v5512_v57, %v5648_v55  ;;  %v4797_v57 = vld [vmem:[%s6029_s5 + $0x10] sm:$0xff]  }
 0x235   : > { %v2462_v51 = vmul.f32 0.01, %v4149_v50  ;;  %v4153_v35 = vadd.f32 %v2250_v54, %v1672_v32  ;;  %2854 = vmatmul.mubr.bf16.vlgmr.msra.gmra.mrb[64].mxu1 %v2585_v42  ;;  %vm2398_vm6 = vcmp.ge.f32.partialorder %v4149_v50, 0.0  ;;  %v4796_v32 = vld [vmem:[%s6029_s5 + $0x50] sm:$0xff]  }
 0x236   : > { %vm2399_vm7 = vcmp.ge.f32.partialorder %v4151_v1, 0.0  ;;  %v2463_v44 = vmul.f32 0.01, %v4151_v1  ;;  %4027 = vmatpush3.bf16.msra.mxu1 %v4793_v49  ;;  %v2525_v46 = vsel %vm2397_vm5, %v4147_v48, %v2461_v38  ;;  %v1682_v49 = vadd.f32 %v5518_v59, %v5648_v55 }
 0x237   : > { %vm2400_vm8 = vcmp.ge.f32.partialorder %v4153_v35, 0.0  ;;  %v2464_v45 = vmul.f32 0.01, %v4153_v35  ;;  %4028 = vmatprep.subr.bf16.mxu1 %v4794_v36  ;;  %v2526_v40 = vsel %vm2398_vm6, %v4149_v50, %v2462_v51  ;;  %v4798_v50 = vld [vmem:[%s6029_s5 + $0x58] sm:$0xff]   ;;  %v1686_v59 = vadd.f32 %v5521_v61, %v5644_v52 }
 0x238   : > { %v2527_v41 = vsel %vm2399_vm7, %v4151_v1, %v2463_v44 }
 0x239   : > { %v2254_v47 = vpop.f32.mrb[8].mxu0  ;;  %v2528_v56 = vsel %vm2400_vm8, %v4153_v35, %v2464_v45  ;;  %v2587_v42 = vpack.c.bf16 %v2527_v41, %v2525_v46  ;;  %v4799_v35 = vld [vmem:[%s6029_s5 + $0x18] sm:$0xff]  }
 0x23a   : > { %v4155_v37 = vadd.f32 %v2254_v47, %v1676_v53  ;;  %v2256_v60 = vpop.f32.mrb[9].mxu0  ;;  %v2588_v43 = vpack.c.bf16 %v2528_v56, %v2526_v40  ;;  %4029 = vmatpush3.bf16.msra.mxu1 %v4795_v34  ;;  %v1688_v53 = vadd.f32 %v5523_v62, %v5648_v55  ;;  %v4800_v34 = vld [vmem:[%s6029_s5 + $0x60] sm:$0xff]   ;;  %v1690_v47 = vadd.f32 %v5526_v63, %v5644_v52 }
 0x23b   : > { %v4157_v48 = vadd.f32 %v2256_v60, %v1678_v33  ;;  %v2258_v39 = vpop.f32.mrb[10].mxu0  ;;  %4030 = vmatprep.subr.bf16.mxu1 %v4796_v32  ;;  %v4801_v62 = vld [vmem:[%s6029_s5 + $0x20] sm:$0xff]  }
 0x23c   : > { %v2465_v36 = vmul.f32 0.01, %v4155_v37  ;;  %v4159_v58 = vadd.f32 %v2258_v39, %v1680_v6  ;;  %v2260_v38 = vpop.f32.mrb[11].mxu0  ;;  %2863 = vmatprep.mubr.bf16.mxu1 %v2588_v43  ;;  %vm2401_vm9 = vcmp.ge.f32.partialorder %v4155_v37, 0.0  ;;  %v1692_v6 = vadd.f32 %v5529_v0, %v5648_v55  ;;  %v4802_v43 = vld [vmem:[%s6029_s5 + $0x68] sm:$0xff]  }
 0x23d   : > { %v2466_v1 = vmul.f32 0.01, %v4157_v48  ;;  %v4161_v54 = vadd.f32 %v2260_v38, %v1682_v49  ;;  %2864 = vmatmul.mubr.bf16.gmra.mrb[68].mxu1 %v2587_v42  ;;  %vm2402_vm10 = vcmp.ge.f32.partialorder %v4157_v48, 0.0  ;;  %v1696_v0 = vadd.f32 %v5532_v2, %v5644_v52 }
 0x23e   : > { %vm2403_vm11 = vcmp.ge.f32.partialorder %v4159_v58, 0.0  ;;  %v2467_v51 = vmul.f32 0.01, %v4159_v58  ;;  %4031 = vmatpush3.bf16.msra.mxu1 %v4797_v57  ;;  %v2529_v45 = vsel %vm2401_vm9, %v4155_v37, %v2465_v36  ;;  %v4803_v36 = vld [vmem:[%s6029_s5 + $0x28] sm:$0xff]   ;;  %v1698_v38 = vadd.f32 %v5534_v3, %v5648_v55  ;;  %v4805_v3 = vld [vmem:[%s6029_s5 + $0x30] sm:$0xff]  }
 0x23f   : > { %vm2404_vm12 = vcmp.ge.f32.partialorder %v4161_v54, 0.0  ;;  %v2468_v44 = vmul.f32 0.01, %v4161_v54  ;;  %4032 = vmatprep.subr.bf16.mxu1 %v4798_v50  ;;  %v2530_v46 = vsel %vm2402_vm10, %v4157_v48, %v2466_v1  ;;  %v4804_v1 = vld [vmem:[%s6029_s5 + $0x70] sm:$0xff]  }
 0x240   : > { %v2531_v33 = vsel %vm2403_vm11, %v4159_v58, %v2467_v51 }
 0x241   : > { %v2264_v32 = vpop.f32.mrb[12].mxu0  ;;  %v2532_v61 = vsel %vm2404_vm12, %v4161_v54, %v2468_v44  ;;  %v2589_v41 = vpack.c.bf16 %v2531_v33, %v2529_v45 }
 0x242   : > { %v4163_v40 = vadd.f32 %v2264_v32, %v1686_v59  ;;  %v2266_v56 = vpop.f32.mrb[13].mxu0  ;;  %v2590_v42 = vpack.c.bf16 %v2532_v61, %v2530_v46  ;;  %4033 = vmatpush3.bf16.msra.mxu1 %v4799_v35  ;;  %v1702_v32 = vadd.f32 %v5540_v5, %v5648_v55  ;;  %v1706_v5 = vadd.f32 %v5543_v7, %v5644_v52 }
 0x243   : > { %v4165_v37 = vadd.f32 %v2266_v56, %v1688_v53  ;;  %v2268_v60 = vpop.f32.mrb[14].mxu0  ;;  %4034 = vmatprep.subr.bf16.mxu1 %v4800_v34  ;;  %v1700_v53 = vadd.f32 %v5537_v4, %v5644_v52  ;;  %v1710_v7 = vadd.f32 %v5548_v9, %v5644_v52 }
 0x244   : > { %v2469_v57 = vmul.f32 0.01, %v4163_v40  ;;  %v4167_v63 = vadd.f32 %v2268_v60, %v1690_v47  ;;  %v2270_v49 = vpop.f32.mrb[15].mxu0  ;;  %2873 = vmatprep.mubr.bf16.mxu1 %v2590_v42  ;;  %vm2405_vm13 = vcmp.ge.f32.partialorder %v4163_v40, 0.0  ;;  %v1708_v60 = vadd.f32 %v5545_v8, %v5648_v55 }
 0x245   : > { %v2470_v48 = vmul.f32 0.01, %v4165_v37  ;;  %v4169_v39 = vadd.f32 %v2270_v49, %v1692_v6  ;;  %2874 = vmatmul.mubr.bf16.gmra.mrb[72].mxu1 %v2589_v41  ;;  %vm2406_vm14 = vcmp.ge.f32.partialorder %v4165_v37, 0.0  ;;  %v4806_v41 = vld [vmem:[%s6029_s5 + $0x78] sm:$0xff]  }
 0x246   : > { %vm2407_vm15 = vcmp.ge.f32.partialorder %v4167_v63, 0.0  ;;  %v2471_v50 = vmul.f32 0.01, %v4167_v63  ;;  %4035 = vmatpush3.bf16.msra.mxu1 %v4801_v62  ;;  %v2533_v54 = vsel %vm2405_vm13, %v4163_v40, %v2469_v57  ;;  %v4807_v6 = vld [vmem:[%s6029_s5 + $0x38] sm:$0xff]  }
 0x247   : > { %vm2408_vm0 = vcmp.ge.f32.partialorder %v4169_v39, 0.0  ;;  %v2472_v58 = vmul.f32 0.01, %v4169_v39  ;;  %4036 = vmatprep.subr.bf16.mxu1 %v4802_v43  ;;  %v2534_v35 = vsel %vm2406_vm14, %v4165_v37, %v2470_v48 }
 0x248   : > { %v2535_v51 = vsel %vm2407_vm15, %v4167_v63, %v2471_v50 }
 0x249   : > { %v2274_v59 = vpop.f32.mrb[16].mxu0  ;;  %v2536_v2 = vsel %vm2408_vm0, %v4169_v39, %v2472_v58  ;;  %v2591_v44 = vpack.c.bf16 %v2535_v51, %v2533_v54  ;;  %v1712_v58 = vadd.f32 %v5550_v10, %v5648_v55  ;;  %v1718_v10 = vadd.f32 %v5554_v13, %v5648_v55 }
 0x24a   : > { %v4171_v34 = vadd.f32 %v2274_v59, %v1696_v0  ;;  %v2276_v45 = vpop.f32.mrb[17].mxu0  ;;  %v2592_v33 = vpack.c.bf16 %v2536_v2, %v2534_v35  ;;  %4037 = vmatpush3.bf16.msra.mxu1 %v4803_v36  ;;  %v1716_v2 = vadd.f32 %v5552_v11, %v5644_v52  ;;  %v1722_v11 = vadd.f32 %v5558_v12, %v5648_v55 }
 0x24b   : > { %v4173_v46 = vadd.f32 %v2276_v45, %v1698_v38  ;;  %v2278_v61 = vpop.f32.mrb[18].mxu0  ;;  %4038 = vmatprep.subr.bf16.mxu1 %v4804_v1  ;;  %v1728_v12 = vadd.f32 %v5562_v16, %v5648_v55 }
 0x24c   : > { %v2473_v47 = vmul.f32 0.01, %v4171_v34  ;;  %v4175_v4 = vadd.f32 %v2278_v61, %v1700_v53  ;;  %v2280_v40 = vpop.f32.mrb[19].mxu0  ;;  %2883 = vmatprep.mubr.bf16.mxu1 %v2592_v33  ;;  %vm2409_vm1 = vcmp.ge.f32.partialorder %v4171_v34, 0.0 }
 0x24d   : > { %v2474_v56 = vmul.f32 0.01, %v4173_v46  ;;  %v4177_v42 = vadd.f32 %v2280_v40, %v1702_v32  ;;  %2884 = vmatmul.mubr.bf16.gmra.mrb[76].mxu1 %v2591_v44  ;;  %vm2410_vm2 = vcmp.ge.f32.partialorder %v4173_v46, 0.0 }
 0x24e   : > { %vm2411_vm3 = vcmp.ge.f32.partialorder %v4175_v4, 0.0  ;;  %v2475_v62 = vmul.f32 0.01, %v4175_v4  ;;  %4039 = vmatpush3.bf16.msra.mxu1 %v4805_v3  ;;  %v2537_v43 = vsel %vm2409_vm1, %v4171_v34, %v2473_v47 }
 0x24f   : > { %vm2412_vm4 = vcmp.ge.f32.partialorder %v4177_v42, 0.0  ;;  %v2476_v37 = vmul.f32 0.01, %v4177_v42  ;;  %4040 = vmatprep.subr.bf16.mxu1 %v4806_v41  ;;  %v2538_v49 = vsel %vm2410_vm2, %v4173_v46, %v2474_v56  ;;  %v1720_v46 = vadd.f32 %v5556_v14, %v5644_v52 }
 0x250   : > { %v2539_v57 = vsel %vm2411_vm3, %v4175_v4, %v2475_v62  ;;  %v1726_v14 = vadd.f32 %v5560_v15, %v5644_v52  ;;  %v1732_v15 = vadd.f32 %v5566_v18, %v5648_v55  ;;  %v1738_v18 = vadd.f32 %v5570_v20, %v5648_v55 }
 0x251   : > { %v2284_v63 = vpop.f32.mrb[20].mxu0  ;;  %v2540_v48 = vsel %vm2412_vm4, %v4177_v42, %v2476_v37  ;;  %v2593_v39 = vpack.c.bf16 %v2539_v57, %v2537_v43 }
 0x252   : > { %v4179_v50 = vadd.f32 %v2284_v63, %v1706_v5  ;;  %v2286_v0 = vpop.f32.mrb[21].mxu0  ;;  %v2594_v36 = vpack.c.bf16 %v2540_v48, %v2538_v49  ;;  %4041 = vmatpush3.bf16.msra.mxu1 %v4807_v6 }
 0x253   : > { %v4181_v38 = vadd.f32 %v2286_v0, %v1708_v60  ;;  %v2288_v1 = vpop.f32.mrb[22].mxu0 }
 0x254   : > { %v2477_v8 = vmul.f32 0.01, %v4179_v50  ;;  %v4183_v54 = vadd.f32 %v2288_v1, %v1710_v7  ;;  %v2290_v51 = vpop.f32.mrb[23].mxu0  ;;  %2893 = vmatprep.mubr.bf16.mxu1 %v2594_v36  ;;  %vm2413_vm5 = vcmp.ge.f32.partialorder %v4179_v50, 0.0 }
 0x255   : > { %v2478_v59 = vmul.f32 0.01, %v4181_v38  ;;  %v4185_v35 = vadd.f32 %v2290_v51, %v1712_v58  ;;  %2894 = vmatmul.mubr.bf16.gmra.mrb[80].mxu1 %v2593_v39  ;;  %vm2414_vm6 = vcmp.ge.f32.partialorder %v4181_v38, 0.0  ;;  %v1730_v39 = vadd.f32 %v5564_v17, %v5644_v52 }
 0x256   : > { %vm2415_vm7 = vcmp.ge.f32.partialorder %v4183_v54, 0.0  ;;  %v2479_v9 = vmul.f32 0.01, %v4183_v54  ;;  %v2541_v53 = vsel %vm2413_vm5, %v4179_v50, %v2477_v8  ;;  %v1736_v17 = vadd.f32 %v5568_v19, %v5644_v52 }
 0x257   : > { %vm2416_vm8 = vcmp.ge.f32.partialorder %v4185_v35, 0.0  ;;  %v2480_v44 = vmul.f32 0.01, %v4185_v35  ;;  %v2542_v33 = vsel %vm2414_vm6, %v4181_v38, %v2478_v59  ;;  %v1742_v19 = vadd.f32 %v5574_v22, %v5648_v55 }
 0x258   : > { %v2543_v34 = vsel %vm2415_vm7, %v4183_v54, %v2479_v9  ;;  %v1748_v22 = vadd.f32 %v5578_v24, %v5648_v55 }
 0x259   : > { %v2294_v45 = vpop.f32.mrb[24].mxu0  ;;  %v2544_v3 = vsel %vm2416_vm8, %v4185_v35, %v2480_v44  ;;  %v2595_v32 = vpack.c.bf16 %v2543_v34, %v2541_v53  ;;  %v1740_v34 = vadd.f32 %v5572_v21, %v5644_v52  ;;  %v1746_v21 = vadd.f32 %v5576_v23, %v5644_v52 }
 0x25a   : > { %v4187_v61 = vadd.f32 %v2294_v45, %v1716_v2  ;;  %v2296_v41 = vpop.f32.mrb[25].mxu0  ;;  %v2596_v47 = vpack.c.bf16 %v2544_v3, %v2542_v33  ;;  %v1752_v23 = vadd.f32 %v5582_v26, %v5648_v55  ;;  %v1758_v26 = vadd.f32 %v5586_v28, %v5648_v55 }
 0x25b   : > { %v4189_v4 = vadd.f32 %v2296_v41, %v1718_v10  ;;  %v2298_v40 = vpop.f32.mrb[26].mxu0 }
 0x25c   : > { %v2481_v56 = vmul.f32 0.01, %v4187_v61  ;;  %v4191_v42 = vadd.f32 %v2298_v40, %v1720_v46  ;;  %v2300_v13 = vpop.f32.mrb[27].mxu0  ;;  %2903 = vmatprep.mubr.bf16.mxu1 %v2596_v47  ;;  %vm2417_vm9 = vcmp.ge.f32.partialorder %v4187_v61, 0.0 }
 0x25d   : > { %v2482_v62 = vmul.f32 0.01, %v4189_v4  ;;  %v4193_v5 = vadd.f32 %v2300_v13, %v1722_v11  ;;  %2904 = vmatmul.mubr.bf16.gmra.mrb[84].mxu1 %v2595_v32  ;;  %vm2418_vm10 = vcmp.ge.f32.partialorder %v4189_v4, 0.0 }
 0x25e   : > { %vm2419_vm11 = vcmp.ge.f32.partialorder %v4191_v42, 0.0  ;;  %v2483_v6 = vmul.f32 0.01, %v4191_v42  ;;  %v2545_v60 = vsel %vm2417_vm9, %v4187_v61, %v2481_v56 }
 0x25f   : > { %vm2420_vm12 = vcmp.ge.f32.partialorder %v4193_v5, 0.0  ;;  %v2484_v37 = vmul.f32 0.01, %v4193_v5  ;;  %v2546_v63 = vsel %vm2418_vm10, %v4189_v4, %v2482_v62 }
 0x260   : > { %v2547_v43 = vsel %vm2419_vm11, %v4191_v42, %v2483_v6 }
 0x261   : > { %v2304_v57 = vpop.f32.mrb[28].mxu0  ;;  %v2548_v49 = vsel %vm2420_vm12, %v4193_v5, %v2484_v37  ;;  %v2597_v48 = vpack.c.bf16 %v2547_v43, %v2545_v60 }
 0x262   : > { %v4195_v7 = vadd.f32 %v2304_v57, %v1726_v14  ;;  %v2306_v50 = vpop.f32.mrb[29].mxu0  ;;  %v2598_v0 = vpack.c.bf16 %v2548_v49, %v2546_v63  ;;  %v1750_v14 = vadd.f32 %v5580_v25, %v5644_v52  ;;  %v1756_v25 = vadd.f32 %v5584_v27, %v5644_v52 }
 0x263   : > { %v4197_v36 = vadd.f32 %v2306_v50, %v1728_v12  ;;  %v2308_v58 = vpop.f32.mrb[30].mxu0  ;;  %v1762_v27 = vadd.f32 %v5590_v30, %v5648_v55  ;;  %v6058_v30 = vld [vmem:[#allocation5_spill] sm:$0xff] }
 0x264   : > { %v2485_v38 = vmul.f32 0.01, %v4195_v7  ;;  %v4199_v1 = vadd.f32 %v2308_v58, %v1730_v39  ;;  %v2310_v16 = vpop.f32.mrb[31].mxu0  ;;  %2913 = vmatprep.mubr.bf16.mxu1 %v2598_v0  ;;  %vm2421_vm13 = vcmp.ge.f32.partialorder %v4195_v7, 0.0 }
 0x265   : > { %v2486_v8 = vmul.f32 0.01, %v4197_v36  ;;  %v4201_v54 = vadd.f32 %v2310_v16, %v1732_v15  ;;  %2914 = vmatmul.mubr.bf16.gmra.mrb[88].mxu1 %v2597_v48  ;;  %vm2422_vm14 = vcmp.ge.f32.partialorder %v4197_v36, 0.0  ;;  %v1760_v16 = vadd.f32 %v5588_v29, %v5644_v52 }
 0x266   : > { %vm2423_vm15 = vcmp.ge.f32.partialorder %v4199_v1, 0.0  ;;  %v2487_v51 = vmul.f32 0.01, %v4199_v1  ;;  %v2549_v35 = vsel %vm2421_vm13, %v4195_v7, %v2485_v38  ;;  %v1766_v29 = vadd.f32 %v5592_v31, %v5644_v52 }
 0x267   : > { %vm2424_vm0 = vcmp.ge.f32.partialorder %v4201_v54, 0.0  ;;  %v2488_v59 = vmul.f32 0.01, %v4201_v54  ;;  %v2550_v44 = vsel %vm2422_vm14, %v4197_v36, %v2486_v8 }
 0x268   : > { %v2551_v9 = vsel %vm2423_vm15, %v4199_v1, %v2487_v51 }
 0x269   : > { %v2314_v2 = vpop.f32.mrb[32].mxu0  ;;  %v2552_v10 = vsel %vm2424_vm0, %v4201_v54, %v2488_v59  ;;  %v2599_v53 = vpack.c.bf16 %v2551_v9, %v2549_v35 }
 0x26a   : > { %v4203_v45 = vadd.f32 %v2314_v2, %v1736_v17  ;;  %v2316_v33 = vpop.f32.mrb[33].mxu0  ;;  %v2600_v3 = vpack.c.bf16 %v2552_v10, %v2550_v44 }
 0x26b   : > { %v4205_v32 = vadd.f32 %v2316_v33, %v1738_v18  ;;  %v2318_v46 = vpop.f32.mrb[34].mxu0 }
 0x26c   : > { %v2489_v61 = vmul.f32 0.01, %v4203_v45  ;;  %v4207_v41 = vadd.f32 %v2318_v46, %v1740_v34  ;;  %v2320_v20 = vpop.f32.mrb[35].mxu0  ;;  %2923 = vmatprep.mubr.bf16.mxu1 %v2600_v3  ;;  %vm2425_vm1 = vcmp.ge.f32.partialorder %v4203_v45, 0.0  ;;  %v6059_v46 = vld [vmem:[#allocation6_spill] sm:$0xff] }
 0x26d   : > { %v2490_v47 = vmul.f32 0.01, %v4205_v32  ;;  %v4209_v11 = vadd.f32 %v2320_v20, %v1742_v19  ;;  %2924 = vmatmul.mubr.bf16.gmra.mrb[92].mxu1 %v2599_v53  ;;  %vm2426_vm2 = vcmp.ge.f32.partialorder %v4205_v32, 0.0  ;;  %v1768_v53 = vadd.f32 %v6058_v30, %v5648_v55 }
 0x26e   : > { %vm2427_vm3 = vcmp.ge.f32.partialorder %v4207_v41, 0.0  ;;  %v2491_v4 = vmul.f32 0.01, %v4207_v41  ;;  %v2553_v56 = vsel %vm2425_vm1, %v4203_v45, %v2489_v61  ;;  %v1770_v61 = vadd.f32 %v6059_v46, %v5644_v52 }
 0x26f   : > { %vm2428_vm4 = vcmp.ge.f32.partialorder %v4209_v11, 0.0  ;;  %v2492_v40 = vmul.f32 0.01, %v4209_v11  ;;  %v2554_v62 = vsel %vm2426_vm2, %v4205_v32, %v2490_v47 }
 0x270   : > { %v2555_v42 = vsel %vm2427_vm3, %v4207_v41, %v2491_v4 }
 0x271   : > { %v2324_v13 = vpop.f32.mrb[36].mxu0  ;;  %v2556_v5 = vsel %vm2428_vm4, %v4209_v11, %v2492_v40  ;;  %v2601_v6 = vpack.c.bf16 %v2555_v42, %v2553_v56  ;;  %v6060_v11 = vld [vmem:[#allocation7_spill] sm:$0xff] }
 0x272   : > { %v4211_v37 = vadd.f32 %v2324_v13, %v1746_v21  ;;  %v2326_v12 = vpop.f32.mrb[37].mxu0  ;;  %v2602_v60 = vpack.c.bf16 %v2556_v5, %v2554_v62  ;;  %v1772_v31 = vadd.f32 %v6060_v11, %v5648_v55  ;;  %v6061_v5 = vld [vmem:[#allocation8_spill] sm:$0xff] }
 0x273   : > { %v4213_v43 = vadd.f32 %v2326_v12, %v1748_v22  ;;  %v2328_v57 = vpop.f32.mrb[38].mxu0  ;;  %v6069_v11 = vld [vmem:[#allocation16_spill] sm:$0xff] }
 0x274   : > { %v2493_v63 = vmul.f32 0.01, %v4211_v37  ;;  %v4215_v49 = vadd.f32 %v2328_v57, %v1750_v14  ;;  %v2330_v24 = vpop.f32.mrb[39].mxu0  ;;  %2933 = vmatprep.mubr.bf16.mxu1 %v2602_v60  ;;  %vm2429_vm5 = vcmp.ge.f32.partialorder %v4211_v37, 0.0 }
 0x275   : > { %v2494_v48 = vmul.f32 0.01, %v4213_v43  ;;  %v4217_v39 = vadd.f32 %v2330_v24, %v1752_v23  ;;  %2934 = vmatmul.mubr.bf16.gmra.mrb[96].mxu1 %v2601_v6  ;;  %vm2430_vm6 = vcmp.ge.f32.partialorder %v4213_v43, 0.0  ;;  %v1776_v6 = vadd.f32 %v6061_v5, %v5644_v52  ;;  %v6063_v24 = vld [vmem:[#allocation10_spill] sm:$0xff] }
 0x276   : > { %vm2431_vm7 = vcmp.ge.f32.partialorder %v4215_v49, 0.0  ;;  %v2495_v7 = vmul.f32 0.01, %v4215_v49  ;;  %v2557_v0 = vsel %vm2429_vm5, %v4211_v37, %v2493_v63  ;;  %v6062_v37 = vld [vmem:[#allocation9_spill] sm:$0xff] }
 0x277   : > { %vm2432_vm8 = vcmp.ge.f32.partialorder %v4217_v39, 0.0  ;;  %v2496_v50 = vmul.f32 0.01, %v4217_v39  ;;  %v2558_v58 = vsel %vm2430_vm6, %v4213_v43, %v2494_v48  ;;  %v1778_v12 = vadd.f32 %v6062_v37, %v5648_v55 }
 0x278   : > { %v2559_v15 = vsel %vm2431_vm7, %v4215_v49, %v2495_v7  ;;  %v1780_v48 = vadd.f32 %v6063_v24, %v5644_v52 }
 0x279   : > { %v2334_v36 = vpop.f32.mrb[40].mxu0  ;;  %v2560_v38 = vsel %vm2432_vm8, %v4217_v39, %v2496_v50  ;;  %v2603_v1 = vpack.c.bf16 %v2559_v15, %v2557_v0  ;;  %v6064_v50 = vld [vmem:[#allocation11_spill] sm:$0xff] }
 0x27a   : > { %v4219_v8 = vadd.f32 %v2334_v36, %v1756_v25  ;;  %v2336_v54 = vpop.f32.mrb[41].mxu0  ;;  %v2604_v51 = vpack.c.bf16 %v2560_v38, %v2558_v58 }
 0x27b   : > { %v4221_v17 = vadd.f32 %v2336_v54, %v1758_v26  ;;  %v2338_v59 = vpop.f32.mrb[42].mxu0  ;;  %v1782_v26 = vadd.f32 %v6064_v50, %v5648_v55  ;;  %v6065_v54 = vld [vmem:[#allocation12_spill] sm:$0xff]  ;;  %v6073_v50 = vld [vmem:[#allocation21_spill] sm:$0xff] }
 0x27c   : > { %v2497_v18 = vmul.f32 0.01, %v4219_v8  ;;  %v4223_v35 = vadd.f32 %v2338_v59, %v1760_v16  ;;  %v2340_v28 = vpop.f32.mrb[43].mxu0  ;;  %2943 = vmatprep.mubr.bf16.mxu1 %v2604_v51  ;;  %vm2433_vm9 = vcmp.ge.f32.partialorder %v4219_v8, 0.0  ;;  %v1786_v51 = vadd.f32 %v6065_v54, %v5644_v52 }
 0x27d   : > { %v2498_v9 = vmul.f32 0.01, %v4221_v17  ;;  %v4225_v2 = vadd.f32 %v2340_v28, %v1762_v27  ;;  %2944 = vmatmul.mubr.bf16.gmra.mrb[100].mxu1 %v2603_v1  ;;  %vm2434_vm10 = vcmp.ge.f32.partialorder %v4221_v17, 0.0 }
 0x27e   : > { %vm2435_vm11 = vcmp.ge.f32.partialorder %v4223_v35, 0.0  ;;  %v2499_v44 = vmul.f32 0.01, %v4223_v35  ;;  %v2561_v34 = vsel %vm2433_vm9, %v4219_v8, %v2497_v18 }
 0x27f   : > { %vm2436_vm12 = vcmp.ge.f32.partialorder %v4225_v2, 0.0  ;;  %v2500_v10 = vmul.f32 0.01, %v4225_v2  ;;  %v2562_v3 = vsel %vm2434_vm10, %v4221_v17, %v2498_v9  ;;  %v6066_v17 = vld [vmem:[#allocation13_spill] sm:$0xff] }
 0x280   : > { %v2563_v45 = vsel %vm2435_vm11, %v4223_v35, %v2499_v44  ;;  %v1788_v59 = vadd.f32 %v6066_v17, %v5648_v55 }
 0x281   : > { %v2344_v33 = vpop.f32.mrb[44].mxu0  ;;  %v2564_v19 = vsel %vm2436_vm12, %v4225_v2, %v2500_v10  ;;  %v2605_v32 = vpack.c.bf16 %v2563_v45, %v2561_v34  ;;  %v6068_v45 = vld [vmem:[#allocation15_spill] sm:$0xff] }
 0x282   : > { %v4227_v41 = vadd.f32 %v2344_v33, %v1766_v29  ;;  %v2346_v20 = vpop.f32.mrb[45].mxu0  ;;  %v2606_v47 = vpack.c.bf16 %v2564_v19, %v2562_v3  ;;  %v6067_v29 = vld [vmem:[#allocation14_spill] sm:$0xff]  ;;  %v1792_v33 = vadd.f32 %v6068_v45, %v5648_v55 }
 0x283   : > { %v4229_v4 = vadd.f32 %v2346_v20, %v1768_v53  ;;  %v2348_v21 = vpop.f32.mrb[46].mxu0  ;;  %v1790_v10 = vadd.f32 %v6067_v29, %v5644_v52 }
 0x284   : > { %v2501_v40 = vmul.f32 0.01, %v4227_v41  ;;  %v4231_v22 = vadd.f32 %v2348_v21, %v1770_v61  ;;  %v2350_v56 = vpop.f32.mrb[47].mxu0  ;;  %2953 = vmatprep.mubr.bf16.mxu1 %v2606_v47  ;;  %vm2437_vm13 = vcmp.ge.f32.partialorder %v4227_v41, 0.0  ;;  %v6070_v21 = vld [vmem:[#allocation17_spill] sm:$0xff] }
 0x285   : > { %v2502_v42 = vmul.f32 0.01, %v4229_v4  ;;  %v4233_v13 = vadd.f32 %v2350_v56, %v1772_v31  ;;  %2954 = vmatmul.mubr.bf16.gmra.mrb[104].mxu1 %v2605_v32  ;;  %vm2438_vm14 = vcmp.ge.f32.partialorder %v4229_v4, 0.0  ;;  %v1796_v31 = vadd.f32 %v6069_v11, %v5644_v52 }
 0x286   : > { %vm2439_vm15 = vcmp.ge.f32.partialorder %v4231_v22, 0.0  ;;  %v2503_v62 = vmul.f32 0.01, %v4231_v22  ;;  %v2565_v60 = vsel %vm2437_vm13, %v4227_v41, %v2501_v40  ;;  %v1798_v40 = vadd.f32 %v6070_v21, %v5648_v55 }
 0x287   : > { %vm2440_vm0 = vcmp.ge.f32.partialorder %v4233_v13, 0.0  ;;  %v2504_v14 = vmul.f32 0.01, %v4233_v13  ;;  %v2566_v57 = vsel %vm2438_vm14, %v4229_v4, %v2502_v42 }
 0x288   : > { %v2567_v23 = vsel %vm2439_vm15, %v4231_v22, %v2503_v62 }
 0x289   : > { %v2354_v43 = vpop.f32.mrb[48].mxu0  ;;  %v2568_v63 = vsel %vm2440_vm0, %v4233_v13, %v2504_v14  ;;  %v2607_v49 = vpack.c.bf16 %v2567_v23, %v2565_v60  ;;  %v6072_v23 = vld [vmem:[#allocation19_spill] sm:$0xff] }
 0x28a   : > { %v4235_v39 = vadd.f32 %v2354_v43, %v1776_v6  ;;  %v2356_v7 = vpop.f32.mrb[49].mxu0  ;;  %v2608_v25 = vpack.c.bf16 %v2568_v63, %v2566_v57  ;;  %v6071_v6 = vld [vmem:[#allocation18_spill] sm:$0xff]  ;;  %v1802_v43 = vadd.f32 %v6072_v23, %v5648_v55 }
 0x28b   : > { %v4237_v0 = vadd.f32 %v2356_v7, %v1778_v12  ;;  %v2358_v15 = vpop.f32.mrb[50].mxu0  ;;  %v1800_v14 = vadd.f32 %v6071_v6, %v5644_v52 }
 0x28c   : > { %v2505_v36 = vmul.f32 0.01, %v4235_v39  ;;  %v4239_v58 = vadd.f32 %v2358_v15, %v1780_v48  ;;  %v2360_v38 = vpop.f32.mrb[51].mxu0  ;;  %2963 = vmatprep.mubr.bf16.mxu1 %v2608_v25  ;;  %vm2441_vm1 = vcmp.ge.f32.partialorder %v4235_v39, 0.0  ;;  %v6074_v15 = vld [vmem:[#allocation22_spill] sm:$0xff] }
 0x28d   : > { %v2506_v1 = vmul.f32 0.01, %v4237_v0  ;;  %v4241_v16 = vadd.f32 %v2360_v38, %v1782_v26  ;;  %2964 = vmatmul.mubr.bf16.gmra.mrb[108].mxu1 %v2607_v49  ;;  %vm2442_vm2 = vcmp.ge.f32.partialorder %v4237_v0, 0.0  ;;  %v1806_v26 = vadd.f32 %v6073_v50, %v5644_v52 }
 0x28e   : > { %vm2443_vm3 = vcmp.ge.f32.partialorder %v4239_v58, 0.0  ;;  %v2507_v8 = vmul.f32 0.01, %v4239_v58  ;;  %v2569_v18 = vsel %vm2441_vm1, %v4235_v39, %v2505_v36  ;;  %v1808_v36 = vadd.f32 %v6074_v15, %v5648_v55 }
 0x28f   : > { %vm2444_vm4 = vcmp.ge.f32.partialorder %v4241_v16, 0.0  ;;  %v2508_v27 = vmul.f32 0.01, %v4241_v16  ;;  %v2570_v9 = vsel %vm2442_vm2, %v4237_v0, %v2506_v1 }
 0x290   : > { %v2571_v35 = vsel %vm2443_vm3, %v4239_v58, %v2507_v8 }
 0x291   : > { %v2364_v28 = vpop.f32.mrb[52].mxu0  ;;  %v2572_v2 = vsel %vm2444_vm4, %v4241_v16, %v2508_v27  ;;  %v2609_v44 = vpack.c.bf16 %v2571_v35, %v2569_v18  ;;  %v6076_v35 = vld [vmem:[#allocation24_spill] sm:$0xff] }
 0x292   : > { %v4243_v30 = vadd.f32 %v2364_v28, %v1786_v51  ;;  %v2366_v53 = vpop.f32.mrb[53].mxu0  ;;  %v2610_v34 = vpack.c.bf16 %v2572_v2, %v2570_v9  ;;  %v6075_v51 = vld [vmem:[#allocation23_spill] sm:$0xff]  ;;  %v1812_v28 = vadd.f32 %v6076_v35, %v5648_v55 }
 0x293   : > { %v4245_v3 = vadd.f32 %v2366_v53, %v1788_v59  ;;  %v2368_v19 = vpop.f32.mrb[54].mxu0  ;;  %v1810_v27 = vadd.f32 %v6075_v51, %v5644_v52 }
 0x294   : > { %v2509_v32 = vmul.f32 0.01, %v4243_v30  ;;  %v4247_v46 = vadd.f32 %v2368_v19, %v1790_v10  ;;  %v2370_v61 = vpop.f32.mrb[55].mxu0  ;;  %2973 = vmatprep.mubr.bf16.mxu1 %v2610_v34  ;;  %vm2445_vm5 = vcmp.ge.f32.partialorder %v4243_v30, 0.0 }
 0x295   : > { %v2510_v41 = vmul.f32 0.01, %v4245_v3  ;;  %v4249_v20 = vadd.f32 %v2370_v61, %v1792_v33  ;;  %2974 = vmatmul.mubr.bf16.gmra.mrb[112].mxu1 %v2609_v44  ;;  %vm2446_vm6 = vcmp.ge.f32.partialorder %v4245_v3, 0.0  ;;  %v6077_v61 = vld [vmem:[#allocation20_spill] sm:$0xff] }
 0x296   : > { %vm2447_vm7 = vcmp.ge.f32.partialorder %v4247_v46, 0.0  ;;  %v2511_v47 = vmul.f32 0.01, %v4247_v46  ;;  %v2573_v22 = vsel %vm2445_vm5, %v4243_v30, %v2509_v32 }
 0x297   : > { %vm2448_vm8 = vcmp.ge.f32.partialorder %v4249_v20, 0.0  ;;  %v2512_v4 = vmul.f32 0.01, %v4249_v20  ;;  %v2574_v13 = vsel %vm2446_vm6, %v4245_v3, %v2510_v41  ;;  %v6078_v41 = vsub.s32 0, %v6077_v61 }
 0x298   : > { %v2575_v56 = vsel %vm2447_vm7, %v4247_v46, %v2511_v47  ;;  %v2649_v46 = vld [vmem:[%s6028_s4] sm:$0x3]  ;;  %v6079_v47 = vsub.s32 1, %v6077_v61 }
 0x299   : > { %v2374_v42 = vpop.f32.mrb[56].mxu0  ;;  %v2576_v62 = vsel %vm2448_vm8, %v4249_v20, %v2512_v4  ;;  %v2611_v5 = vpack.c.bf16 %v2575_v56, %v2573_v22  ;;  %v5828_v20 = vrot.slane %v2649_v46, %v6078_v41 }
 0x29a   : > { %v4251_v37 = vadd.f32 %v2374_v42, %v1796_v31  ;;  %v2376_v12 = vpop.f32.mrb[57].mxu0  ;;  %v2612_v60 = vpack.c.bf16 %v2576_v62, %v2574_v13  ;;  %v5832_v11 = vrot.slane %v2649_v46, %v6079_v47 }
 0x29b   : > { %v4253_v57 = vadd.f32 %v2376_v12, %v1798_v40  ;;  %v2378_v63 = vpop.f32.mrb[58].mxu0 }
 0x29c   : > { %v2513_v49 = vmul.f32 0.01, %v4251_v37  ;;  %v4255_v24 = vadd.f32 %v2378_v63, %v1800_v14  ;;  %v2380_v48 = vpop.f32.mrb[59].mxu0  ;;  %2983 = vmatprep.mubr.bf16.mxu1 %v2612_v60  ;;  %vm2449_vm9 = vcmp.ge.f32.partialorder %v4251_v37, 0.0 }
 0x29d   : > { %v2514_v39 = vmul.f32 0.01, %v4253_v57  ;;  %v4257_v7 = vadd.f32 %v2380_v48, %v1802_v43  ;;  %2984 = vmatmul.mubr.bf16.gmra.mrb[116].mxu1 %v2611_v5  ;;  %vm2450_vm10 = vcmp.ge.f32.partialorder %v4253_v57, 0.0 }
 0x29e   : > { %vm2451_vm11 = vcmp.ge.f32.partialorder %v4255_v24, 0.0  ;;  %v2515_v25 = vmul.f32 0.01, %v4255_v24  ;;  %v2577_v58 = vsel %vm2449_vm9, %v4251_v37, %v2513_v49 }
 0x29f   : > { %vm2452_vm12 = vcmp.ge.f32.partialorder %v4257_v7, 0.0  ;;  %v2516_v0 = vmul.f32 0.01, %v4257_v7  ;;  %v2578_v16 = vsel %vm2450_vm10, %v4253_v57, %v2514_v39 }
 0x2a0   : > { %v2579_v38 = vsel %vm2451_vm11, %v4255_v24, %v2515_v25 }
 0x2a1   : > { %v2384_v1 = vpop.f32.mrb[60].mxu0  ;;  %v2580_v8 = vsel %vm2452_vm12, %v4257_v7, %v2516_v0  ;;  %v2613_v54 = vpack.c.bf16 %v2579_v38, %v2577_v58 }
 0x2a2   : > { %v4259_v17 = vadd.f32 %v2384_v1, %v1806_v26  ;;  %v2386_v59 = vpop.f32.mrb[61].mxu0  ;;  %v2614_v18 = vpack.c.bf16 %v2580_v8, %v2578_v16 }
 0x2a3   : > { %v4261_v9 = vadd.f32 %v2386_v59, %v1808_v36  ;;  %v2388_v2 = vpop.f32.mrb[62].mxu0 }
 0x2a4   : > { %v2517_v44 = vmul.f32 0.01, %v4259_v17  ;;  %v4263_v29 = vadd.f32 %v2388_v2, %v1810_v27  ;;  %v2390_v10 = vpop.f32.mrb[63].mxu0  ;;  %2993 = vmatprep.mubr.bf16.mxu1 %v2614_v18  ;;  %vm2453_vm13 = vcmp.ge.f32.partialorder %v4259_v17, 0.0 }
 0x2a5   : > { %v2518_v30 = vmul.f32 0.01, %v4261_v9  ;;  %v4265_v53 = vadd.f32 %v2390_v10, %v1812_v28  ;;  %2994 = vmatmul.mubr.bf16.gmra.mrb[120].mxu1 %v2613_v54  ;;  %vm2454_vm14 = vcmp.ge.f32.partialorder %v4261_v9, 0.0 }
 0x2a6   : > { %vm2455_vm15 = vcmp.ge.f32.partialorder %v4263_v29, 0.0  ;;  %v2519_v34 = vmul.f32 0.01, %v4263_v29  ;;  %v2581_v45 = vsel %vm2453_vm13, %v4259_v17, %v2517_v44 }
 0x2a7   : > { %vm2456_vm0 = vcmp.ge.f32.partialorder %v4265_v53, 0.0  ;;  %v2520_v52 = vmul.f32 0.01, %v4265_v53  ;;  %v2582_v3 = vsel %vm2454_vm14, %v4261_v9, %v2518_v30 }
 0x2a8   : > { %v2583_v33 = vsel %vm2455_vm15, %v4263_v29, %v2519_v34 }
 0x2a9   : > { %v2584_v19 = vsel %vm2456_vm0, %v4265_v53, %v2520_v52  ;;  %v2615_v55 = vpack.c.bf16 %v2583_v33, %v2581_v45 }
 0x2aa   : > { %v2616_v32 = vpack.c.bf16 %v2584_v19, %v2582_v3 }
 0x2ac   : > { %3003 = vmatprep.mubr.bf16.mxu1 %v2616_v32 }
 0x2ad   : > { %3004 = vmatmul.mubr.bf16.gmra.mrb[124].mxu1 %v2615_v55 }
 0x308   : > { %v2855_v31 = vpop.f32.mrb[64].mxu1 }
 0x309   : > { %v2856_v4 = vadd.f32 %v2855_v31, %v5828_v20  ;;  %v2857_v21 = vpop.f32.mrb[65].mxu1 }
 0x30a   : > { %v2858_v40 = vadd.f32 %v2857_v21, %v5832_v11  ;;  %v2859_v22 = vpop.f32.mrb[66].mxu1 }
 0x30b   : > { %v3078_v56 = vmul.f32 0.01, %v2856_v4  ;;  %v2860_v42 = vadd.f32 %v2859_v22, %v5828_v20  ;;  %v2861_v13 = vpop.f32.mrb[67].mxu1  ;;  %vm3014_vm1 = vcmp.ge.f32.partialorder %v2856_v4, 0.0 }
 0x30c   : > { %v3079_v62 = vmul.f32 0.01, %v2858_v40  ;;  %v2862_v5 = vadd.f32 %v2861_v13, %v5832_v11  ;;  %vm3015_vm2 = vcmp.ge.f32.partialorder %v2858_v40, 0.0 }
 0x30d   : > { %vm3016_vm3 = vcmp.ge.f32.partialorder %v2860_v42, 0.0  ;;  %v3080_v6 = vmul.f32 0.01, %v2860_v42  ;;  %v3142_v37 = vsel %vm3014_vm1, %v2856_v4, %v3078_v56 }
 0x30e   : > { %vm3017_vm4 = vcmp.ge.f32.partialorder %v2862_v5, 0.0  ;;  %v3081_v14 = vmul.f32 0.01, %v2862_v5  ;;  %v3143_v43 = vsel %vm3015_vm2, %v2858_v40, %v3079_v62 }
 0x30f   : > { %v3144_v12 = vsel %vm3016_vm3, %v2860_v42, %v3080_v6 }
 0x310   : > { %v3206_v60 = vpack.c.bf16 %v3144_v12, %v3142_v37  ;;  %v2865_v23 = vpop.f32.mrb[68].mxu1  ;;  %v3145_v57 = vsel %vm3017_vm4, %v2862_v5, %v3081_v14 }
 0x311   : > { %v2866_v63 = vadd.f32 %v2865_v23, %v5828_v20  ;;  %v2867_v49 = vpop.f32.mrb[69].mxu1  ;;  %v3207_v24 = vpack.c.bf16 %v3145_v57, %v3143_v43 }
 0x312   : > { %v2868_v48 = vadd.f32 %v2867_v49, %v5832_v11  ;;  %v2869_v39 = vpop.f32.mrb[70].mxu1 }
 0x313   : > { %v3082_v7 = vmul.f32 0.01, %v2866_v63  ;;  %v2870_v25 = vadd.f32 %v2869_v39, %v5828_v20  ;;  %v2871_v50 = vpop.f32.mrb[71].mxu1  ;;  %3405 = vmatprep.mubr.bf16.mxu1 %v3207_v24  ;;  %vm3018_vm5 = vcmp.ge.f32.partialorder %v2866_v63, 0.0 }
 0x314   : > { %v3083_v26 = vmul.f32 0.01, %v2868_v48  ;;  %v2872_v0 = vadd.f32 %v2871_v50, %v5832_v11  ;;  %3406 = vmatmul.mubr.bf16.vlgmr.msra.gmra.mrb[128].mxu1 %v3206_v60  ;;  %vm3019_vm6 = vcmp.ge.f32.partialorder %v2868_v48, 0.0 }
 0x315   : > { %vm3020_vm7 = vcmp.ge.f32.partialorder %v2870_v25, 0.0  ;;  %v3084_v15 = vmul.f32 0.01, %v2870_v25  ;;  %v3146_v58 = vsel %vm3018_vm5, %v2866_v63, %v3082_v7 }
 0x316   : > { %vm3021_vm8 = vcmp.ge.f32.partialorder %v2872_v0, 0.0  ;;  %v3085_v36 = vmul.f32 0.01, %v2872_v0  ;;  %v3147_v16 = vsel %vm3019_vm6, %v2868_v48, %v3083_v26 }
 0x317   : > { %v3148_v38 = vsel %vm3020_vm7, %v2870_v25, %v3084_v15 }
 0x318   : > { %v2875_v1 = vpop.f32.mrb[72].mxu1  ;;  %v3149_v8 = vsel %vm3021_vm8, %v2872_v0, %v3085_v36  ;;  %v3208_v54 = vpack.c.bf16 %v3148_v38, %v3146_v58 }
 0x319   : > { %v2876_v51 = vadd.f32 %v2875_v1, %v5828_v20  ;;  %v2877_v27 = vpop.f32.mrb[73].mxu1  ;;  %v3209_v17 = vpack.c.bf16 %v3149_v8, %v3147_v16 }
 0x31a   : > { %v2878_v59 = vadd.f32 %v2877_v27, %v5832_v11  ;;  %v2879_v18 = vpop.f32.mrb[74].mxu1 }
 0x31b   : > { %v3086_v35 = vmul.f32 0.01, %v2876_v51  ;;  %v2880_v28 = vadd.f32 %v2879_v18, %v5828_v20  ;;  %v2881_v9 = vpop.f32.mrb[75].mxu1  ;;  %3413 = vmatprep.mubr.bf16.mxu1 %v3209_v17  ;;  %vm3022_vm9 = vcmp.ge.f32.partialorder %v2876_v51, 0.0 }
 0x31c   : > { %v3087_v2 = vmul.f32 0.01, %v2878_v59  ;;  %v2882_v44 = vadd.f32 %v2881_v9, %v5832_v11  ;;  %3414 = vmatmul.mubr.bf16.gmra.mrb[132].mxu1 %v3208_v54  ;;  %vm3023_vm10 = vcmp.ge.f32.partialorder %v2878_v59, 0.0 }
 0x31d   : > { %vm3024_vm11 = vcmp.ge.f32.partialorder %v2880_v28, 0.0  ;;  %v3088_v29 = vmul.f32 0.01, %v2880_v28  ;;  %v3150_v30 = vsel %vm3022_vm9, %v2876_v51, %v3086_v35 }
 0x31e   : > { %vm3025_vm12 = vcmp.ge.f32.partialorder %v2882_v44, 0.0  ;;  %v3089_v10 = vmul.f32 0.01, %v2882_v44  ;;  %v3151_v52 = vsel %vm3023_vm10, %v2878_v59, %v3087_v2 }
 0x31f   : > { %v3152_v53 = vsel %vm3024_vm11, %v2880_v28, %v3088_v29 }
 0x320   : > { %v2885_v34 = vpop.f32.mrb[76].mxu1  ;;  %v3153_v45 = vsel %vm3025_vm12, %v2882_v44, %v3089_v10  ;;  %v3210_v33 = vpack.c.bf16 %v3152_v53, %v3150_v30 }
 0x321   : > { %v2886_v3 = vadd.f32 %v2885_v34, %v5828_v20  ;;  %v2887_v19 = vpop.f32.mrb[77].mxu1  ;;  %v3211_v55 = vpack.c.bf16 %v3153_v45, %v3151_v52 }
 0x322   : > { %v2888_v32 = vadd.f32 %v2887_v19, %v5832_v11  ;;  %v2889_v46 = vpop.f32.mrb[78].mxu1 }
 0x323   : > { %v3090_v61 = vmul.f32 0.01, %v2886_v3  ;;  %v2890_v41 = vadd.f32 %v2889_v46, %v5828_v20  ;;  %v2891_v47 = vpop.f32.mrb[79].mxu1  ;;  %3421 = vmatprep.mubr.bf16.mxu1 %v3211_v55  ;;  %vm3026_vm13 = vcmp.ge.f32.partialorder %v2886_v3, 0.0 }
 0x324   : > { %v3091_v31 = vmul.f32 0.01, %v2888_v32  ;;  %v2892_v4 = vadd.f32 %v2891_v47, %v5832_v11  ;;  %3422 = vmatmul.mubr.bf16.gmra.mrb[136].mxu1 %v3210_v33  ;;  %vm3027_vm14 = vcmp.ge.f32.partialorder %v2888_v32, 0.0 }
 0x325   : > { %vm3028_vm15 = vcmp.ge.f32.partialorder %v2890_v41, 0.0  ;;  %v3092_v21 = vmul.f32 0.01, %v2890_v41  ;;  %v3154_v22 = vsel %vm3026_vm13, %v2886_v3, %v3090_v61 }
 0x326   : > { %vm3029_vm0 = vcmp.ge.f32.partialorder %v2892_v4, 0.0  ;;  %v3093_v40 = vmul.f32 0.01, %v2892_v4  ;;  %v3155_v13 = vsel %vm3027_vm14, %v2888_v32, %v3091_v31 }
 0x327   : > { %v3156_v56 = vsel %vm3028_vm15, %v2890_v41, %v3092_v21 }
 0x328   : > { %v2895_v42 = vpop.f32.mrb[80].mxu1  ;;  %v3157_v62 = vsel %vm3029_vm0, %v2892_v4, %v3093_v40  ;;  %v3212_v5 = vpack.c.bf16 %v3156_v56, %v3154_v22 }
 0x329   : > { %v2896_v6 = vadd.f32 %v2895_v42, %v5828_v20  ;;  %v2897_v14 = vpop.f32.mrb[81].mxu1  ;;  %v3213_v37 = vpack.c.bf16 %v3157_v62, %v3155_v13 }
 0x32a   : > { %v2898_v12 = vadd.f32 %v2897_v14, %v5832_v11  ;;  %v2899_v60 = vpop.f32.mrb[82].mxu1 }
 0x32b   : > { %v3094_v23 = vmul.f32 0.01, %v2896_v6  ;;  %v2900_v43 = vadd.f32 %v2899_v60, %v5828_v20  ;;  %v2901_v57 = vpop.f32.mrb[83].mxu1  ;;  %3429 = vmatprep.mubr.bf16.mxu1 %v3213_v37  ;;  %vm3030_vm1 = vcmp.ge.f32.partialorder %v2896_v6, 0.0 }
 0x32c   : > { %v3095_v63 = vmul.f32 0.01, %v2898_v12  ;;  %v2902_v49 = vadd.f32 %v2901_v57, %v5832_v11  ;;  %3430 = vmatmul.mubr.bf16.gmra.mrb[140].mxu1 %v3212_v5  ;;  %vm3031_vm2 = vcmp.ge.f32.partialorder %v2898_v12, 0.0 }
 0x32d   : > { %vm3032_vm3 = vcmp.ge.f32.partialorder %v2900_v43, 0.0  ;;  %v3096_v24 = vmul.f32 0.01, %v2900_v43  ;;  %v3158_v39 = vsel %vm3030_vm1, %v2896_v6, %v3094_v23 }
 0x32e   : > { %vm3033_vm4 = vcmp.ge.f32.partialorder %v2902_v49, 0.0  ;;  %v3097_v48 = vmul.f32 0.01, %v2902_v49  ;;  %v3159_v50 = vsel %vm3031_vm2, %v2898_v12, %v3095_v63 }
 0x32f   : > { %v3160_v7 = vsel %vm3032_vm3, %v2900_v43, %v3096_v24 }
 0x330   : > { %v2905_v25 = vpop.f32.mrb[84].mxu1  ;;  %v3161_v26 = vsel %vm3033_vm4, %v2902_v49, %v3097_v48  ;;  %v3214_v0 = vpack.c.bf16 %v3160_v7, %v3158_v39 }
 0x331   : > { %v2906_v15 = vadd.f32 %v2905_v25, %v5828_v20  ;;  %v2907_v36 = vpop.f32.mrb[85].mxu1  ;;  %v3215_v58 = vpack.c.bf16 %v3161_v26, %v3159_v50 }
 0x332   : > { %v2908_v38 = vadd.f32 %v2907_v36, %v5832_v11  ;;  %v2909_v1 = vpop.f32.mrb[86].mxu1 }
 0x333   : > { %v3098_v16 = vmul.f32 0.01, %v2906_v15  ;;  %v2910_v8 = vadd.f32 %v2909_v1, %v5828_v20  ;;  %v2911_v54 = vpop.f32.mrb[87].mxu1  ;;  %3437 = vmatprep.mubr.bf16.mxu1 %v3215_v58  ;;  %vm3034_vm5 = vcmp.ge.f32.partialorder %v2906_v15, 0.0 }
 0x334   : > { %v3099_v51 = vmul.f32 0.01, %v2908_v38  ;;  %v2912_v27 = vadd.f32 %v2911_v54, %v5832_v11  ;;  %3438 = vmatmul.mubr.bf16.gmra.mrb[144].mxu1 %v3214_v0  ;;  %vm3035_vm6 = vcmp.ge.f32.partialorder %v2908_v38, 0.0 }
 0x335   : > { %vm3036_vm7 = vcmp.ge.f32.partialorder %v2910_v8, 0.0  ;;  %v3100_v17 = vmul.f32 0.01, %v2910_v8  ;;  %v3162_v18 = vsel %vm3034_vm5, %v2906_v15, %v3098_v16 }
 0x336   : > { %vm3037_vm8 = vcmp.ge.f32.partialorder %v2912_v27, 0.0  ;;  %v3101_v59 = vmul.f32 0.01, %v2912_v27  ;;  %v3163_v9 = vsel %vm3035_vm6, %v2908_v38, %v3099_v51 }
 0x337   : > { %v3164_v35 = vsel %vm3036_vm7, %v2910_v8, %v3100_v17 }
 0x338   : > { %v2915_v28 = vpop.f32.mrb[88].mxu1  ;;  %v3165_v2 = vsel %vm3037_vm8, %v2912_v27, %v3101_v59  ;;  %v3216_v44 = vpack.c.bf16 %v3164_v35, %v3162_v18 }
 0x339   : > { %v2916_v29 = vadd.f32 %v2915_v28, %v5828_v20  ;;  %v2917_v10 = vpop.f32.mrb[89].mxu1  ;;  %v3217_v30 = vpack.c.bf16 %v3165_v2, %v3163_v9 }
 0x33a   : > { %v2918_v53 = vadd.f32 %v2917_v10, %v5832_v11  ;;  %v2919_v34 = vpop.f32.mrb[90].mxu1 }
 0x33b   : > { %v3102_v52 = vmul.f32 0.01, %v2916_v29  ;;  %v2920_v45 = vadd.f32 %v2919_v34, %v5828_v20  ;;  %v2921_v33 = vpop.f32.mrb[91].mxu1  ;;  %3445 = vmatprep.mubr.bf16.mxu1 %v3217_v30  ;;  %vm3038_vm9 = vcmp.ge.f32.partialorder %v2916_v29, 0.0 }
 0x33c   : > { %v3103_v3 = vmul.f32 0.01, %v2918_v53  ;;  %v2922_v19 = vadd.f32 %v2921_v33, %v5832_v11  ;;  %3446 = vmatmul.mubr.bf16.gmra.mrb[148].mxu1 %v3216_v44  ;;  %vm3039_vm10 = vcmp.ge.f32.partialorder %v2918_v53, 0.0 }
 0x33d   : > { %vm3040_vm11 = vcmp.ge.f32.partialorder %v2920_v45, 0.0  ;;  %v3104_v55 = vmul.f32 0.01, %v2920_v45  ;;  %v3166_v46 = vsel %vm3038_vm9, %v2916_v29, %v3102_v52 }
 0x33e   : > { %vm3041_vm12 = vcmp.ge.f32.partialorder %v2922_v19, 0.0  ;;  %v3105_v32 = vmul.f32 0.01, %v2922_v19  ;;  %v3167_v47 = vsel %vm3039_vm10, %v2918_v53, %v3103_v3 }
 0x33f   : > { %v3168_v61 = vsel %vm3040_vm11, %v2920_v45, %v3104_v55 }
 0x340   : > { %v2925_v41 = vpop.f32.mrb[92].mxu1  ;;  %v3169_v31 = vsel %vm3041_vm12, %v2922_v19, %v3105_v32  ;;  %v3218_v4 = vpack.c.bf16 %v3168_v61, %v3166_v46 }
 0x341   : > { %v2926_v21 = vadd.f32 %v2925_v41, %v5828_v20  ;;  %v2927_v40 = vpop.f32.mrb[93].mxu1  ;;  %v3219_v22 = vpack.c.bf16 %v3169_v31, %v3167_v47 }
 0x342   : > { %v2928_v56 = vadd.f32 %v2927_v40, %v5832_v11  ;;  %v2929_v42 = vpop.f32.mrb[94].mxu1 }
 0x343   : > { %v3106_v13 = vmul.f32 0.01, %v2926_v21  ;;  %v2930_v62 = vadd.f32 %v2929_v42, %v5828_v20  ;;  %v2931_v5 = vpop.f32.mrb[95].mxu1  ;;  %3453 = vmatprep.mubr.bf16.mxu1 %v3219_v22  ;;  %vm3042_vm13 = vcmp.ge.f32.partialorder %v2926_v21, 0.0 }
 0x344   : > { %v3107_v6 = vmul.f32 0.01, %v2928_v56  ;;  %v2932_v14 = vadd.f32 %v2931_v5, %v5832_v11  ;;  %3454 = vmatmul.mubr.bf16.gmra.mrb[152].mxu1 %v3218_v4  ;;  %vm3043_vm14 = vcmp.ge.f32.partialorder %v2928_v56, 0.0 }
 0x345   : > { %vm3044_vm15 = vcmp.ge.f32.partialorder %v2930_v62, 0.0  ;;  %v3108_v37 = vmul.f32 0.01, %v2930_v62  ;;  %v3170_v60 = vsel %vm3042_vm13, %v2926_v21, %v3106_v13 }
 0x346   : > { %vm3045_vm0 = vcmp.ge.f32.partialorder %v2932_v14, 0.0  ;;  %v3109_v12 = vmul.f32 0.01, %v2932_v14  ;;  %v3171_v57 = vsel %vm3043_vm14, %v2928_v56, %v3107_v6 }
 0x347   : > { %v3172_v23 = vsel %vm3044_vm15, %v2930_v62, %v3108_v37 }
 0x348   : > { %v2935_v43 = vpop.f32.mrb[96].mxu1  ;;  %v3173_v63 = vsel %vm3045_vm0, %v2932_v14, %v3109_v12  ;;  %v3220_v49 = vpack.c.bf16 %v3172_v23, %v3170_v60 }
 0x349   : > { %v2936_v24 = vadd.f32 %v2935_v43, %v5828_v20  ;;  %v2937_v48 = vpop.f32.mrb[97].mxu1  ;;  %v3221_v39 = vpack.c.bf16 %v3173_v63, %v3171_v57 }
 0x34a   : > { %v2938_v7 = vadd.f32 %v2937_v48, %v5832_v11  ;;  %v2939_v25 = vpop.f32.mrb[98].mxu1 }
 0x34b   : > { %v3110_v50 = vmul.f32 0.01, %v2936_v24  ;;  %v2940_v26 = vadd.f32 %v2939_v25, %v5828_v20  ;;  %v2941_v0 = vpop.f32.mrb[99].mxu1  ;;  %3461 = vmatprep.mubr.bf16.mxu1 %v3221_v39  ;;  %vm3046_vm1 = vcmp.ge.f32.partialorder %v2936_v24, 0.0 }
 0x34c   : > { %v3111_v15 = vmul.f32 0.01, %v2938_v7  ;;  %v2942_v36 = vadd.f32 %v2941_v0, %v5832_v11  ;;  %3462 = vmatmul.mubr.bf16.gmra.mrb[156].mxu1 %v3220_v49  ;;  %vm3047_vm2 = vcmp.ge.f32.partialorder %v2938_v7, 0.0 }
 0x34d   : > { %vm3048_vm3 = vcmp.ge.f32.partialorder %v2940_v26, 0.0  ;;  %v3112_v58 = vmul.f32 0.01, %v2940_v26  ;;  %v3174_v1 = vsel %vm3046_vm1, %v2936_v24, %v3110_v50 }
 0x34e   : > { %vm3049_vm4 = vcmp.ge.f32.partialorder %v2942_v36, 0.0  ;;  %v3113_v38 = vmul.f32 0.01, %v2942_v36  ;;  %v3175_v54 = vsel %vm3047_vm2, %v2938_v7, %v3111_v15 }
 0x34f   : > { %v3176_v16 = vsel %vm3048_vm3, %v2940_v26, %v3112_v58 }
 0x350   : > { %v2945_v8 = vpop.f32.mrb[100].mxu1  ;;  %v3177_v51 = vsel %vm3049_vm4, %v2942_v36, %v3113_v38  ;;  %v3222_v27 = vpack.c.bf16 %v3176_v16, %v3174_v1 }
 0x351   : > { %v2946_v17 = vadd.f32 %v2945_v8, %v5828_v20  ;;  %v2947_v59 = vpop.f32.mrb[101].mxu1  ;;  %v3223_v18 = vpack.c.bf16 %v3177_v51, %v3175_v54 }
 0x352   : > { %v2948_v35 = vadd.f32 %v2947_v59, %v5832_v11  ;;  %v2949_v28 = vpop.f32.mrb[102].mxu1 }
 0x353   : > { %v3114_v9 = vmul.f32 0.01, %v2946_v17  ;;  %v2950_v2 = vadd.f32 %v2949_v28, %v5828_v20  ;;  %v2951_v44 = vpop.f32.mrb[103].mxu1  ;;  %3469 = vmatprep.mubr.bf16.mxu1 %v3223_v18  ;;  %vm3050_vm5 = vcmp.ge.f32.partialorder %v2946_v17, 0.0 }
 0x354   : > { %v3115_v29 = vmul.f32 0.01, %v2948_v35  ;;  %v2952_v10 = vadd.f32 %v2951_v44, %v5832_v11  ;;  %3470 = vmatmul.mubr.bf16.gmra.mrb[160].mxu1 %v3222_v27  ;;  %vm3051_vm6 = vcmp.ge.f32.partialorder %v2948_v35, 0.0 }
 0x355   : > { %vm3052_vm7 = vcmp.ge.f32.partialorder %v2950_v2, 0.0  ;;  %v3116_v30 = vmul.f32 0.01, %v2950_v2  ;;  %v3178_v34 = vsel %vm3050_vm5, %v2946_v17, %v3114_v9 }
 0x356   : > { %vm3053_vm8 = vcmp.ge.f32.partialorder %v2952_v10, 0.0  ;;  %v3117_v53 = vmul.f32 0.01, %v2952_v10  ;;  %v3179_v33 = vsel %vm3051_vm6, %v2948_v35, %v3115_v29 }
 0x357   : > { %v3180_v52 = vsel %vm3052_vm7, %v2950_v2, %v3116_v30 }
 0x358   : > { %v2955_v45 = vpop.f32.mrb[104].mxu1  ;;  %v3181_v3 = vsel %vm3053_vm8, %v2952_v10, %v3117_v53  ;;  %v3224_v19 = vpack.c.bf16 %v3180_v52, %v3178_v34 }
 0x359   : > { %v2956_v55 = vadd.f32 %v2955_v45, %v5828_v20  ;;  %v2957_v32 = vpop.f32.mrb[105].mxu1  ;;  %v3225_v46 = vpack.c.bf16 %v3181_v3, %v3179_v33 }
 0x35a   : > { %v2958_v61 = vadd.f32 %v2957_v32, %v5832_v11  ;;  %v2959_v41 = vpop.f32.mrb[106].mxu1 }
 0x35b   : > { %v3118_v47 = vmul.f32 0.01, %v2956_v55  ;;  %v2960_v31 = vadd.f32 %v2959_v41, %v5828_v20  ;;  %v2961_v4 = vpop.f32.mrb[107].mxu1  ;;  %3477 = vmatprep.mubr.bf16.mxu1 %v3225_v46  ;;  %vm3054_vm9 = vcmp.ge.f32.partialorder %v2956_v55, 0.0 }
 0x35c   : > { %v3119_v21 = vmul.f32 0.01, %v2958_v61  ;;  %v2962_v40 = vadd.f32 %v2961_v4, %v5832_v11  ;;  %3478 = vmatmul.mubr.bf16.gmra.mrb[164].mxu1 %v3224_v19  ;;  %vm3055_vm10 = vcmp.ge.f32.partialorder %v2958_v61, 0.0 }
 0x35d   : > { %vm3056_vm11 = vcmp.ge.f32.partialorder %v2960_v31, 0.0  ;;  %v3120_v22 = vmul.f32 0.01, %v2960_v31  ;;  %v3182_v42 = vsel %vm3054_vm9, %v2956_v55, %v3118_v47 }
 0x35e   : > { %vm3057_vm12 = vcmp.ge.f32.partialorder %v2962_v40, 0.0  ;;  %v3121_v56 = vmul.f32 0.01, %v2962_v40  ;;  %v3183_v5 = vsel %vm3055_vm10, %v2958_v61, %v3119_v21 }
 0x35f   : > { %v3184_v13 = vsel %vm3056_vm11, %v2960_v31, %v3120_v22 }
 0x360   : > { %v2965_v62 = vpop.f32.mrb[108].mxu1  ;;  %v3185_v6 = vsel %vm3057_vm12, %v2962_v40, %v3121_v56  ;;  %v3226_v14 = vpack.c.bf16 %v3184_v13, %v3182_v42 }
 0x361   : > { %v2966_v37 = vadd.f32 %v2965_v62, %v5828_v20  ;;  %v2967_v12 = vpop.f32.mrb[109].mxu1  ;;  %v3227_v60 = vpack.c.bf16 %v3185_v6, %v3183_v5 }
 0x362   : > { %v2968_v23 = vadd.f32 %v2967_v12, %v5832_v11  ;;  %v2969_v43 = vpop.f32.mrb[110].mxu1 }
 0x363   : > { %v3122_v57 = vmul.f32 0.01, %v2966_v37  ;;  %v2970_v63 = vadd.f32 %v2969_v43, %v5828_v20  ;;  %v2971_v49 = vpop.f32.mrb[111].mxu1  ;;  %3485 = vmatprep.mubr.bf16.mxu1 %v3227_v60  ;;  %vm3058_vm13 = vcmp.ge.f32.partialorder %v2966_v37, 0.0 }
 0x364   : > { %v3123_v24 = vmul.f32 0.01, %v2968_v23  ;;  %v2972_v48 = vadd.f32 %v2971_v49, %v5832_v11  ;;  %3486 = vmatmul.mubr.bf16.gmra.mrb[168].mxu1 %v3226_v14  ;;  %vm3059_vm14 = vcmp.ge.f32.partialorder %v2968_v23, 0.0 }
 0x365   : > { %vm3060_vm15 = vcmp.ge.f32.partialorder %v2970_v63, 0.0  ;;  %v3124_v39 = vmul.f32 0.01, %v2970_v63  ;;  %v3186_v25 = vsel %vm3058_vm13, %v2966_v37, %v3122_v57 }
 0x366   : > { %vm3061_vm0 = vcmp.ge.f32.partialorder %v2972_v48, 0.0  ;;  %v3125_v7 = vmul.f32 0.01, %v2972_v48  ;;  %v3187_v0 = vsel %vm3059_vm14, %v2968_v23, %v3123_v24 }
 0x367   : > { %v3188_v50 = vsel %vm3060_vm15, %v2970_v63, %v3124_v39 }
 0x368   : > { %v2975_v26 = vpop.f32.mrb[112].mxu1  ;;  %v3189_v15 = vsel %vm3061_vm0, %v2972_v48, %v3125_v7  ;;  %v3228_v36 = vpack.c.bf16 %v3188_v50, %v3186_v25 }
 0x369   : > { %v2976_v58 = vadd.f32 %v2975_v26, %v5828_v20  ;;  %v2977_v38 = vpop.f32.mrb[113].mxu1  ;;  %v3229_v1 = vpack.c.bf16 %v3189_v15, %v3187_v0 }
 0x36a   : > { %v2978_v16 = vadd.f32 %v2977_v38, %v5832_v11  ;;  %v2979_v8 = vpop.f32.mrb[114].mxu1 }
 0x36b   : > { %v3126_v54 = vmul.f32 0.01, %v2976_v58  ;;  %v2980_v51 = vadd.f32 %v2979_v8, %v5828_v20  ;;  %v2981_v27 = vpop.f32.mrb[115].mxu1  ;;  %3493 = vmatprep.mubr.bf16.mxu1 %v3229_v1  ;;  %vm3062_vm1 = vcmp.ge.f32.partialorder %v2976_v58, 0.0 }
 0x36c   : > { %v3127_v17 = vmul.f32 0.01, %v2978_v16  ;;  %v2982_v59 = vadd.f32 %v2981_v27, %v5832_v11  ;;  %3494 = vmatmul.mubr.bf16.gmra.mrb[172].mxu1 %v3228_v36  ;;  %vm3063_vm2 = vcmp.ge.f32.partialorder %v2978_v16, 0.0 }
 0x36d   : > { %vm3064_vm3 = vcmp.ge.f32.partialorder %v2980_v51, 0.0  ;;  %v3128_v18 = vmul.f32 0.01, %v2980_v51  ;;  %v3190_v28 = vsel %vm3062_vm1, %v2976_v58, %v3126_v54 }
 0x36e   : > { %vm3065_vm4 = vcmp.ge.f32.partialorder %v2982_v59, 0.0  ;;  %v3129_v35 = vmul.f32 0.01, %v2982_v59  ;;  %v3191_v44 = vsel %vm3063_vm2, %v2978_v16, %v3127_v17 }
 0x36f   : > { %v3192_v9 = vsel %vm3064_vm3, %v2980_v51, %v3128_v18 }
 0x370   : > { %v2985_v2 = vpop.f32.mrb[116].mxu1  ;;  %v3193_v29 = vsel %vm3065_vm4, %v2982_v59, %v3129_v35  ;;  %v3230_v10 = vpack.c.bf16 %v3192_v9, %v3190_v28 }
 0x371   : > { %v2986_v30 = vadd.f32 %v2985_v2, %v5828_v20  ;;  %v2987_v53 = vpop.f32.mrb[117].mxu1  ;;  %v3231_v34 = vpack.c.bf16 %v3193_v29, %v3191_v44 }
 0x372   : > { %v2988_v52 = vadd.f32 %v2987_v53, %v5832_v11  ;;  %v2989_v45 = vpop.f32.mrb[118].mxu1 }
 0x373   : > { %v3130_v33 = vmul.f32 0.01, %v2986_v30  ;;  %v2990_v3 = vadd.f32 %v2989_v45, %v5828_v20  ;;  %v2991_v19 = vpop.f32.mrb[119].mxu1  ;;  %3501 = vmatprep.mubr.bf16.mxu1 %v3231_v34  ;;  %vm3066_vm5 = vcmp.ge.f32.partialorder %v2986_v30, 0.0 }
 0x374   : > { %v3131_v55 = vmul.f32 0.01, %v2988_v52  ;;  %v2992_v32 = vadd.f32 %v2991_v19, %v5832_v11  ;;  %3502 = vmatmul.mubr.bf16.gmra.mrb[176].mxu1 %v3230_v10  ;;  %vm3067_vm6 = vcmp.ge.f32.partialorder %v2988_v52, 0.0 }
 0x375   : > { %vm3068_vm7 = vcmp.ge.f32.partialorder %v2990_v3, 0.0  ;;  %v3132_v46 = vmul.f32 0.01, %v2990_v3  ;;  %v3194_v41 = vsel %vm3066_vm5, %v2986_v30, %v3130_v33 }
 0x376   : > { %vm3069_vm8 = vcmp.ge.f32.partialorder %v2992_v32, 0.0  ;;  %v3133_v61 = vmul.f32 0.01, %v2992_v32  ;;  %v3195_v4 = vsel %vm3067_vm6, %v2988_v52, %v3131_v55 }
 0x377   : > { %v3196_v47 = vsel %vm3068_vm7, %v2990_v3, %v3132_v46 }
 0x378   : > { %v2995_v31 = vpop.f32.mrb[120].mxu1  ;;  %v3197_v21 = vsel %vm3069_vm8, %v2992_v32, %v3133_v61  ;;  %v3232_v40 = vpack.c.bf16 %v3196_v47, %v3194_v41 }
 0x379   : > { %v2996_v22 = vadd.f32 %v2995_v31, %v5828_v20  ;;  %v2997_v56 = vpop.f32.mrb[121].mxu1  ;;  %v3233_v42 = vpack.c.bf16 %v3197_v21, %v3195_v4 }
 0x37a   : > { %v2998_v13 = vadd.f32 %v2997_v56, %v5832_v11  ;;  %v2999_v62 = vpop.f32.mrb[122].mxu1 }
 0x37b   : > { %v3134_v5 = vmul.f32 0.01, %v2996_v22  ;;  %v3000_v6 = vadd.f32 %v2999_v62, %v5828_v20  ;;  %v3001_v14 = vpop.f32.mrb[123].mxu1  ;;  %3509 = vmatprep.mubr.bf16.mxu1 %v3233_v42  ;;  %vm3070_vm9 = vcmp.ge.f32.partialorder %v2996_v22, 0.0 }
 0x37c   : > { %v3135_v37 = vmul.f32 0.01, %v2998_v13  ;;  %v3002_v12 = vadd.f32 %v3001_v14, %v5832_v11  ;;  %3510 = vmatmul.mubr.bf16.gmra.mrb[180].mxu1 %v3232_v40  ;;  %vm3071_vm10 = vcmp.ge.f32.partialorder %v2998_v13, 0.0 }
 0x37d   : > { %vm3072_vm11 = vcmp.ge.f32.partialorder %v3000_v6, 0.0  ;;  %v3136_v60 = vmul.f32 0.01, %v3000_v6  ;;  %v3198_v43 = vsel %vm3070_vm9, %v2996_v22, %v3134_v5 }
 0x37e   : > { %vm3073_vm12 = vcmp.ge.f32.partialorder %v3002_v12, 0.0  ;;  %v3137_v23 = vmul.f32 0.01, %v3002_v12  ;;  %v3199_v49 = vsel %vm3071_vm10, %v2998_v13, %v3135_v37 }
 0x37f   : > { %v3200_v57 = vsel %vm3072_vm11, %v3000_v6, %v3136_v60 }
 0x380   : > { %v3005_v63 = vpop.f32.mrb[124].mxu1  ;;  %v3201_v24 = vsel %vm3073_vm12, %v3002_v12, %v3137_v23  ;;  %v3234_v48 = vpack.c.bf16 %v3200_v57, %v3198_v43 }
 0x381   : > { %v3006_v39 = vadd.f32 %v3005_v63, %v5828_v20  ;;  %v3007_v7 = vpop.f32.mrb[125].mxu1  ;;  %v3235_v25 = vpack.c.bf16 %v3201_v24, %v3199_v49 }
 0x382   : > { %v3008_v50 = vadd.f32 %v3007_v7, %v5832_v11  ;;  %v3009_v26 = vpop.f32.mrb[126].mxu1 }
 0x383   : > { %v3138_v0 = vmul.f32 0.01, %v3006_v39  ;;  %v3010_v15 = vadd.f32 %v3009_v26, %v5828_v20  ;;  %v3011_v36 = vpop.f32.mrb[127].mxu1  ;;  %3517 = vmatprep.mubr.bf16.mxu1 %v3235_v25  ;;  %vm3074_vm13 = vcmp.ge.f32.partialorder %v3006_v39, 0.0 }
 0x384   : > { %v3139_v58 = vmul.f32 0.01, %v3008_v50  ;;  %v3012_v38 = vadd.f32 %v3011_v36, %v5832_v11  ;;  %3518 = vmatmul.mubr.bf16.gmra.mrb[184].mxu1 %v3234_v48  ;;  %vm3075_vm14 = vcmp.ge.f32.partialorder %v3008_v50, 0.0  ;;  %v5902_v11 = vld [vmem:[%s6030_s6] ss:$0 sm:$0xff] }
 0x385   : > { %vm3076_vm15 = vcmp.ge.f32.partialorder %v3010_v15, 0.0  ;;  %v3140_v1 = vmul.f32 0.01, %v3010_v15  ;;  %v3202_v8 = vsel %vm3074_vm13, %v3006_v39, %v3138_v0 }
 0x386   : > { %vm3077_vm0 = vcmp.ge.f32.partialorder %v3012_v38, 0.0  ;;  %v3141_v16 = vmul.f32 0.01, %v3012_v38  ;;  %v3203_v51 = vsel %vm3075_vm14, %v3008_v50, %v3139_v58 }
 0x387   : > { %v3204_v54 = vsel %vm3076_vm15, %v3010_v15, %v3140_v1 }
 0x388   : > { %v3205_v27 = vsel %vm3077_vm0, %v3012_v38, %v3141_v16  ;;  %v3236_v17 = vpack.c.bf16 %v3204_v54, %v3202_v8 }
 0x389   : > { %v3237_v20 = vpack.c.bf16 %v3205_v27, %v3203_v51 }
 0x38b   : > { %3525 = vmatprep.mubr.bf16.mxu1 %v3237_v20 }
 0x38c   : > { %3526 = vmatmul.mubr.bf16.gmra.mrb[188].mxu1 %v3236_v17 }
 0x3e7   : > { %v4042_v59 = vpop.f32.mrb[128].mxu1 }
 0x3e8   : > { %v4043_v18 = vpop.f32.mrb[129].mxu1 }
 0x3e9   : > { %v4044_v35 = vadd.f32 %v4043_v18, %v4042_v59  ;;  %v4045_v28 = vpop.f32.mrb[130].mxu1 }
 0x3ea   : > { %v4046_v9 = vpop.f32.mrb[131].mxu1 }
 0x3eb   : > { %v3408_v2 = vadd.f32 %v4044_v35, %v5902_v11  ;;  %v4047_v44 = vadd.f32 %v4046_v9, %v4045_v28 }
 0x3ed   : > { %vm3534_vm1 = vcmp.ge.f32.partialorder %v3408_v2, 0.0  ;;  %v3566_v29 = vmul.f32 0.01, %v3408_v2  ;;  %v3411_v10 = vadd.f32 %v4047_v44, %v5902_v11 }
 0x3ef   : > { %v3598_v30 = vsel %vm3534_vm1, %v3408_v2, %v3566_v29  ;;  %vm3535_vm2 = vcmp.ge.f32.partialorder %v3411_v10, 0.0  ;;  %v3567_v53 = vmul.f32 0.01, %v3411_v10  ;;  %v4048_v34 = vpop.f32.mrb[132].mxu1 }
 0x3f0   : > { %3630 = vst [vmem:[%s5908_s15] sm:$0xff] %v3598_v30  ;;  %v4049_v52 = vpop.f32.mrb[133].mxu1 }
 0x3f1   : > { %v3599_v45 = vsel %vm3535_vm2, %v3411_v10, %v3567_v53  ;;  %v4050_v33 = vadd.f32 %v4049_v52, %v4048_v34  ;;  %v4051_v3 = vpop.f32.mrb[134].mxu1 }
 0x3f2   : > { %3631 = vst [vmem:[%s5908_s15 + $0x8] sm:$0xff] %v3599_v45  ;;  %v4052_v19 = vpop.f32.mrb[135].mxu1 }
 0x3f3   : > { %v3416_v55 = vadd.f32 %v4050_v33, %v5902_v11  ;;  %v4053_v32 = vadd.f32 %v4052_v19, %v4051_v3 }
 0x3f5   : > { %vm3536_vm3 = vcmp.ge.f32.partialorder %v3416_v55, 0.0  ;;  %v3568_v46 = vmul.f32 0.01, %v3416_v55  ;;  %v3419_v61 = vadd.f32 %v4053_v32, %v5902_v11 }
 0x3f7   : > { %v3600_v41 = vsel %vm3536_vm3, %v3416_v55, %v3568_v46  ;;  %vm3537_vm4 = vcmp.ge.f32.partialorder %v3419_v61, 0.0  ;;  %v3569_v47 = vmul.f32 0.01, %v3419_v61  ;;  %v4054_v31 = vpop.f32.mrb[136].mxu1 }
 0x3f8   : > { %3632 = vst [vmem:[%s5908_s15 + $0x10] sm:$0xff] %v3600_v41  ;;  %v4055_v4 = vpop.f32.mrb[137].mxu1 }
 0x3f9   : > { %v3601_v21 = vsel %vm3537_vm4, %v3419_v61, %v3569_v47  ;;  %v4056_v40 = vadd.f32 %v4055_v4, %v4054_v31  ;;  %v4057_v22 = vpop.f32.mrb[138].mxu1 }
 0x3fa   : > { %3633 = vst [vmem:[%s5908_s15 + $0x18] sm:$0xff] %v3601_v21  ;;  %v4058_v56 = vpop.f32.mrb[139].mxu1 }
 0x3fb   : > { %v3424_v42 = vadd.f32 %v4056_v40, %v5902_v11  ;;  %v4059_v13 = vadd.f32 %v4058_v56, %v4057_v22 }
 0x3fd   : > { %vm3538_vm5 = vcmp.ge.f32.partialorder %v3424_v42, 0.0  ;;  %v3570_v62 = vmul.f32 0.01, %v3424_v42  ;;  %v3427_v5 = vadd.f32 %v4059_v13, %v5902_v11 }
 0x3ff   : > { %v3602_v6 = vsel %vm3538_vm5, %v3424_v42, %v3570_v62  ;;  %vm3539_vm6 = vcmp.ge.f32.partialorder %v3427_v5, 0.0  ;;  %v3571_v14 = vmul.f32 0.01, %v3427_v5  ;;  %v4060_v37 = vpop.f32.mrb[140].mxu1 }
 0x400   : > { %3634 = vst [vmem:[%s5908_s15 + $0x20] sm:$0xff] %v3602_v6  ;;  %v4061_v12 = vpop.f32.mrb[141].mxu1 }
 0x401   : > { %v3603_v60 = vsel %vm3539_vm6, %v3427_v5, %v3571_v14  ;;  %v4062_v23 = vadd.f32 %v4061_v12, %v4060_v37  ;;  %v4063_v43 = vpop.f32.mrb[142].mxu1 }
 0x402   : > { %3635 = vst [vmem:[%s5908_s15 + $0x28] sm:$0xff] %v3603_v60  ;;  %v4064_v57 = vpop.f32.mrb[143].mxu1 }
 0x403   : > { %v3432_v63 = vadd.f32 %v4062_v23, %v5902_v11  ;;  %v4065_v49 = vadd.f32 %v4064_v57, %v4063_v43 }
 0x405   : > { %vm3540_vm7 = vcmp.ge.f32.partialorder %v3432_v63, 0.0  ;;  %v3572_v24 = vmul.f32 0.01, %v3432_v63  ;;  %v3435_v48 = vadd.f32 %v4065_v49, %v5902_v11 }
 0x407   : > { %v3604_v39 = vsel %vm3540_vm7, %v3432_v63, %v3572_v24  ;;  %vm3541_vm8 = vcmp.ge.f32.partialorder %v3435_v48, 0.0  ;;  %v3573_v7 = vmul.f32 0.01, %v3435_v48  ;;  %v4066_v25 = vpop.f32.mrb[144].mxu1 }
 0x408   : > { %3636 = vst [vmem:[%s5908_s15 + $0x30] sm:$0xff] %v3604_v39  ;;  %v4067_v50 = vpop.f32.mrb[145].mxu1 }
 0x409   : > { %v3605_v26 = vsel %vm3541_vm8, %v3435_v48, %v3573_v7  ;;  %v4068_v0 = vadd.f32 %v4067_v50, %v4066_v25  ;;  %v4069_v15 = vpop.f32.mrb[146].mxu1 }
 0x40a   : > { %3637 = vst [vmem:[%s5908_s15 + $0x38] sm:$0xff] %v3605_v26  ;;  %v4070_v36 = vpop.f32.mrb[147].mxu1 }
 0x40b   : > { %v3440_v58 = vadd.f32 %v4068_v0, %v5902_v11  ;;  %v4071_v38 = vadd.f32 %v4070_v36, %v4069_v15 }
 0x40d   : > { %vm3542_vm9 = vcmp.ge.f32.partialorder %v3440_v58, 0.0  ;;  %v3574_v1 = vmul.f32 0.01, %v3440_v58  ;;  %v3443_v16 = vadd.f32 %v4071_v38, %v5902_v11 }
 0x40f   : > { %v3606_v8 = vsel %vm3542_vm9, %v3440_v58, %v3574_v1  ;;  %vm3543_vm10 = vcmp.ge.f32.partialorder %v3443_v16, 0.0  ;;  %v3575_v54 = vmul.f32 0.01, %v3443_v16  ;;  %v4072_v51 = vpop.f32.mrb[148].mxu1 }
 0x410   : > { %3638 = vst [vmem:[%s5908_s15 + $0x40] sm:$0xff] %v3606_v8  ;;  %v4073_v27 = vpop.f32.mrb[149].mxu1 }
 0x411   : > { %v3607_v17 = vsel %vm3543_vm10, %v3443_v16, %v3575_v54  ;;  %v4074_v20 = vadd.f32 %v4073_v27, %v4072_v51  ;;  %v4075_v59 = vpop.f32.mrb[150].mxu1 }
 0x412   : > { %3639 = vst [vmem:[%s5908_s15 + $0x48] sm:$0xff] %v3607_v17  ;;  %v4076_v18 = vpop.f32.mrb[151].mxu1 }
 0x413   : > { %v3448_v35 = vadd.f32 %v4074_v20, %v5902_v11  ;;  %v4077_v28 = vadd.f32 %v4076_v18, %v4075_v59 }
 0x415   : > { %vm3544_vm11 = vcmp.ge.f32.partialorder %v3448_v35, 0.0  ;;  %v3576_v9 = vmul.f32 0.01, %v3448_v35  ;;  %v3451_v2 = vadd.f32 %v4077_v28, %v5902_v11 }
 0x417   : > { %v3608_v44 = vsel %vm3544_vm11, %v3448_v35, %v3576_v9  ;;  %vm3545_vm12 = vcmp.ge.f32.partialorder %v3451_v2, 0.0  ;;  %v3577_v29 = vmul.f32 0.01, %v3451_v2  ;;  %v4078_v10 = vpop.f32.mrb[152].mxu1 }
 0x418   : > { %3640 = vst [vmem:[%s5908_s15 + $0x50] sm:$0xff] %v3608_v44  ;;  %v4079_v30 = vpop.f32.mrb[153].mxu1 }
 0x419   : > { %v3609_v53 = vsel %vm3545_vm12, %v3451_v2, %v3577_v29  ;;  %v4080_v34 = vadd.f32 %v4079_v30, %v4078_v10  ;;  %v4081_v52 = vpop.f32.mrb[154].mxu1 }
 0x41a   : > { %3641 = vst [vmem:[%s5908_s15 + $0x58] sm:$0xff] %v3609_v53  ;;  %v4082_v45 = vpop.f32.mrb[155].mxu1 }
 0x41b   : > { %v3456_v33 = vadd.f32 %v4080_v34, %v5902_v11  ;;  %v4083_v3 = vadd.f32 %v4082_v45, %v4081_v52 }
 0x41d   : > { %vm3546_vm13 = vcmp.ge.f32.partialorder %v3456_v33, 0.0  ;;  %v3578_v19 = vmul.f32 0.01, %v3456_v33  ;;  %v3459_v55 = vadd.f32 %v4083_v3, %v5902_v11 }
 0x41f   : > { %v3610_v32 = vsel %vm3546_vm13, %v3456_v33, %v3578_v19  ;;  %vm3547_vm14 = vcmp.ge.f32.partialorder %v3459_v55, 0.0  ;;  %v3579_v46 = vmul.f32 0.01, %v3459_v55  ;;  %v4084_v61 = vpop.f32.mrb[156].mxu1 }
 0x420   : > { %3642 = vst [vmem:[%s5908_s15 + $0x60] sm:$0xff] %v3610_v32  ;;  %v4085_v41 = vpop.f32.mrb[157].mxu1 }
 0x421   : > { %v3611_v47 = vsel %vm3547_vm14, %v3459_v55, %v3579_v46  ;;  %v4086_v31 = vadd.f32 %v4085_v41, %v4084_v61  ;;  %v4087_v4 = vpop.f32.mrb[158].mxu1 }
 0x422   : > { %3643 = vst [vmem:[%s5908_s15 + $0x68] sm:$0xff] %v3611_v47  ;;  %v4088_v21 = vpop.f32.mrb[159].mxu1 }
 0x423   : > { %v3464_v40 = vadd.f32 %v4086_v31, %v5902_v11  ;;  %v4089_v22 = vadd.f32 %v4088_v21, %v4087_v4 }
 0x425   : > { %vm3548_vm15 = vcmp.ge.f32.partialorder %v3464_v40, 0.0  ;;  %v3580_v56 = vmul.f32 0.01, %v3464_v40  ;;  %v3467_v42 = vadd.f32 %v4089_v22, %v5902_v11 }
 0x427   : > { %v3612_v13 = vsel %vm3548_vm15, %v3464_v40, %v3580_v56  ;;  %vm3549_vm0 = vcmp.ge.f32.partialorder %v3467_v42, 0.0  ;;  %v3581_v62 = vmul.f32 0.01, %v3467_v42  ;;  %v4090_v5 = vpop.f32.mrb[160].mxu1 }
 0x428   : > { %3644 = vst [vmem:[%s5908_s15 + $0x70] sm:$0xff] %v3612_v13  ;;  %v4091_v6 = vpop.f32.mrb[161].mxu1 }
 0x429   : > { %v3613_v14 = vsel %vm3549_vm0, %v3467_v42, %v3581_v62  ;;  %v4092_v37 = vadd.f32 %v4091_v6, %v4090_v5  ;;  %v4093_v12 = vpop.f32.mrb[162].mxu1 }
 0x42a   : > { %3645 = vst [vmem:[%s5908_s15 + $0x78] sm:$0xff] %v3613_v14  ;;  %v4094_v60 = vpop.f32.mrb[163].mxu1 }
 0x42b   : > { %v3472_v23 = vadd.f32 %v4092_v37, %v5902_v11  ;;  %v4095_v43 = vadd.f32 %v4094_v60, %v4093_v12 }
 0x42d   : > { %vm3550_vm1 = vcmp.ge.f32.partialorder %v3472_v23, 0.0  ;;  %v3582_v57 = vmul.f32 0.01, %v3472_v23  ;;  %v3475_v63 = vadd.f32 %v4095_v43, %v5902_v11 }
 0x42f   : > { %v3614_v49 = vsel %vm3550_vm1, %v3472_v23, %v3582_v57  ;;  %vm3551_vm2 = vcmp.ge.f32.partialorder %v3475_v63, 0.0  ;;  %v3583_v24 = vmul.f32 0.01, %v3475_v63  ;;  %v4096_v48 = vpop.f32.mrb[164].mxu1 }
 0x430   : > { %3646 = vst [vmem:[%s5908_s15 + $0x80] sm:$0xff] %v3614_v49  ;;  %v4097_v39 = vpop.f32.mrb[165].mxu1 }
 0x431   : > { %v3615_v7 = vsel %vm3551_vm2, %v3475_v63, %v3583_v24  ;;  %v4098_v25 = vadd.f32 %v4097_v39, %v4096_v48  ;;  %v4099_v50 = vpop.f32.mrb[166].mxu1 }
 0x432   : > { %3647 = vst [vmem:[%s5908_s15 + $0x88] sm:$0xff] %v3615_v7  ;;  %v4100_v26 = vpop.f32.mrb[167].mxu1 }
 0x433   : > { %v3480_v0 = vadd.f32 %v4098_v25, %v5902_v11  ;;  %v4101_v15 = vadd.f32 %v4100_v26, %v4099_v50 }
 0x435   : > { %vm3552_vm3 = vcmp.ge.f32.partialorder %v3480_v0, 0.0  ;;  %v3584_v36 = vmul.f32 0.01, %v3480_v0  ;;  %v3483_v58 = vadd.f32 %v4101_v15, %v5902_v11 }
 0x437   : > { %v3616_v38 = vsel %vm3552_vm3, %v3480_v0, %v3584_v36  ;;  %vm3553_vm4 = vcmp.ge.f32.partialorder %v3483_v58, 0.0  ;;  %v3585_v1 = vmul.f32 0.01, %v3483_v58  ;;  %v4102_v16 = vpop.f32.mrb[168].mxu1 }
 0x438   : > { %3648 = vst [vmem:[%s5908_s15 + $0x90] sm:$0xff] %v3616_v38  ;;  %v4103_v8 = vpop.f32.mrb[169].mxu1 }
 0x439   : > { %v3617_v54 = vsel %vm3553_vm4, %v3483_v58, %v3585_v1  ;;  %v4104_v51 = vadd.f32 %v4103_v8, %v4102_v16  ;;  %v4105_v27 = vpop.f32.mrb[170].mxu1 }
 0x43a   : > { %3649 = vst [vmem:[%s5908_s15 + $0x98] sm:$0xff] %v3617_v54  ;;  %v4106_v17 = vpop.f32.mrb[171].mxu1 }
 0x43b   : > { %v3488_v20 = vadd.f32 %v4104_v51, %v5902_v11  ;;  %v4107_v59 = vadd.f32 %v4106_v17, %v4105_v27 }
 0x43d   : > { %vm3554_vm5 = vcmp.ge.f32.partialorder %v3488_v20, 0.0  ;;  %v3586_v18 = vmul.f32 0.01, %v3488_v20  ;;  %v3491_v35 = vadd.f32 %v4107_v59, %v5902_v11 }
 0x43f   : > { %v3618_v28 = vsel %vm3554_vm5, %v3488_v20, %v3586_v18  ;;  %vm3555_vm6 = vcmp.ge.f32.partialorder %v3491_v35, 0.0  ;;  %v3587_v9 = vmul.f32 0.01, %v3491_v35  ;;  %v4108_v2 = vpop.f32.mrb[172].mxu1 }
 0x440   : > { %3650 = vst [vmem:[%s5908_s15 + $0xa0] sm:$0xff] %v3618_v28  ;;  %v4109_v44 = vpop.f32.mrb[173].mxu1 }
 0x441   : > { %v3619_v29 = vsel %vm3555_vm6, %v3491_v35, %v3587_v9  ;;  %v4110_v10 = vadd.f32 %v4109_v44, %v4108_v2  ;;  %v4111_v30 = vpop.f32.mrb[174].mxu1 }
 0x442   : > { %3651 = vst [vmem:[%s5908_s15 + $0xa8] sm:$0xff] %v3619_v29  ;;  %v4112_v53 = vpop.f32.mrb[175].mxu1 }
 0x443   : > { %v3496_v34 = vadd.f32 %v4110_v10, %v5902_v11  ;;  %v4113_v52 = vadd.f32 %v4112_v53, %v4111_v30 }
 0x445   : > { %vm3556_vm7 = vcmp.ge.f32.partialorder %v3496_v34, 0.0  ;;  %v3588_v45 = vmul.f32 0.01, %v3496_v34  ;;  %v3499_v33 = vadd.f32 %v4113_v52, %v5902_v11 }
 0x447   : > { %v3620_v3 = vsel %vm3556_vm7, %v3496_v34, %v3588_v45  ;;  %vm3557_vm8 = vcmp.ge.f32.partialorder %v3499_v33, 0.0  ;;  %v3589_v19 = vmul.f32 0.01, %v3499_v33  ;;  %v4114_v55 = vpop.f32.mrb[176].mxu1 }
 0x448   : > { %3652 = vst [vmem:[%s5908_s15 + $0xb0] sm:$0xff] %v3620_v3  ;;  %v4115_v32 = vpop.f32.mrb[177].mxu1 }
 0x449   : > { %v3621_v46 = vsel %vm3557_vm8, %v3499_v33, %v3589_v19  ;;  %v4116_v61 = vadd.f32 %v4115_v32, %v4114_v55  ;;  %v4117_v41 = vpop.f32.mrb[178].mxu1 }
 0x44a   : > { %3653 = vst [vmem:[%s5908_s15 + $0xb8] sm:$0xff] %v3621_v46  ;;  %v4118_v47 = vpop.f32.mrb[179].mxu1 }
 0x44b   : > { %v3504_v31 = vadd.f32 %v4116_v61, %v5902_v11  ;;  %v4119_v4 = vadd.f32 %v4118_v47, %v4117_v41 }
 0x44d   : > { %vm3558_vm9 = vcmp.ge.f32.partialorder %v3504_v31, 0.0  ;;  %v3590_v21 = vmul.f32 0.01, %v3504_v31  ;;  %v3507_v40 = vadd.f32 %v4119_v4, %v5902_v11 }
 0x44f   : > { %v3622_v22 = vsel %vm3558_vm9, %v3504_v31, %v3590_v21  ;;  %vm3559_vm10 = vcmp.ge.f32.partialorder %v3507_v40, 0.0  ;;  %v3591_v56 = vmul.f32 0.01, %v3507_v40  ;;  %v4120_v42 = vpop.f32.mrb[180].mxu1 }
 0x450   : > { %3654 = vst [vmem:[%s5908_s15 + $0xc0] sm:$0xff] %v3622_v22  ;;  %v4121_v13 = vpop.f32.mrb[181].mxu1 }
 0x451   : > { %v3623_v62 = vsel %vm3559_vm10, %v3507_v40, %v3591_v56  ;;  %v4122_v5 = vadd.f32 %v4121_v13, %v4120_v42  ;;  %v4123_v6 = vpop.f32.mrb[182].mxu1 }
 0x452   : > { %3655 = vst [vmem:[%s5908_s15 + $0xc8] sm:$0xff] %v3623_v62  ;;  %v4124_v14 = vpop.f32.mrb[183].mxu1 }
 0x453   : > { %v3512_v37 = vadd.f32 %v4122_v5, %v5902_v11  ;;  %v4125_v12 = vadd.f32 %v4124_v14, %v4123_v6 }
 0x455   : > { %vm3560_vm11 = vcmp.ge.f32.partialorder %v3512_v37, 0.0  ;;  %v3592_v60 = vmul.f32 0.01, %v3512_v37  ;;  %v3515_v23 = vadd.f32 %v4125_v12, %v5902_v11 }
 0x457   : > { %v3624_v43 = vsel %vm3560_vm11, %v3512_v37, %v3592_v60  ;;  %vm3561_vm12 = vcmp.ge.f32.partialorder %v3515_v23, 0.0  ;;  %v3593_v57 = vmul.f32 0.01, %v3515_v23  ;;  %v4126_v63 = vpop.f32.mrb[184].mxu1 }
 0x458   : > { %3656 = vst [vmem:[%s5908_s15 + $0xd0] sm:$0xff] %v3624_v43  ;;  %v4127_v49 = vpop.f32.mrb[185].mxu1 }
 0x459   : > { %v3625_v24 = vsel %vm3561_vm12, %v3515_v23, %v3593_v57  ;;  %v4128_v48 = vadd.f32 %v4127_v49, %v4126_v63  ;;  %v4129_v39 = vpop.f32.mrb[186].mxu1 }
 0x45a   : > { %3657 = vst [vmem:[%s5908_s15 + $0xd8] sm:$0xff] %v3625_v24  ;;  %v4130_v7 = vpop.f32.mrb[187].mxu1 }
 0x45b   : > { %v3520_v25 = vadd.f32 %v4128_v48, %v5902_v11  ;;  %v4131_v50 = vadd.f32 %v4130_v7, %v4129_v39 }
 0x45d   : > { %vm3562_vm13 = vcmp.ge.f32.partialorder %v3520_v25, 0.0  ;;  %v3594_v26 = vmul.f32 0.01, %v3520_v25  ;;  %v3523_v0 = vadd.f32 %v4131_v50, %v5902_v11 }
 0x45f   : > { %v3626_v15 = vsel %vm3562_vm13, %v3520_v25, %v3594_v26  ;;  %vm3563_vm14 = vcmp.ge.f32.partialorder %v3523_v0, 0.0  ;;  %v3595_v36 = vmul.f32 0.01, %v3523_v0  ;;  %v4132_v58 = vpop.f32.mrb[188].mxu1 }
 0x460   : > { %3658 = vst [vmem:[%s5908_s15 + $0xe0] sm:$0xff] %v3626_v15  ;;  %v4133_v38 = vpop.f32.mrb[189].mxu1 }
 0x461   : > { %v3627_v1 = vsel %vm3563_vm14, %v3523_v0, %v3595_v36  ;;  %v4134_v16 = vadd.f32 %v4133_v38, %v4132_v58  ;;  %v4135_v8 = vpop.f32.mrb[190].mxu1 }
 0x462   : > { %3659 = vst [vmem:[%s5908_s15 + $0xe8] sm:$0xff] %v3627_v1  ;;  %v4136_v54 = vpop.f32.mrb[191].mxu1 }
 0x463   : > { %v3528_v51 = vadd.f32 %v4134_v16, %v5902_v11  ;;  %v4137_v27 = vadd.f32 %v4136_v54, %v4135_v8 }
 0x465   : > { %vm3564_vm15 = vcmp.ge.f32.partialorder %v3528_v51, 0.0  ;;  %v3596_v17 = vmul.f32 0.01, %v3528_v51  ;;  %v3531_v20 = vadd.f32 %v4137_v27, %v5902_v11 }
 0x467   : > { %v3628_v59 = vsel %vm3564_vm15, %v3528_v51, %v3596_v17  ;;  %vm3565_vm0 = vcmp.ge.f32.partialorder %v3531_v20, 0.0  ;;  %v3597_v18 = vmul.f32 0.01, %v3531_v20 }
 0x468   : > { %3660 = vst [vmem:[%s5908_s15 + $0xf0] sm:$0xff] %v3628_v59 }
 0x469   : > { %v3629_v35 = vsel %vm3565_vm0, %v3531_v20, %v3597_v18 }
 0x46a   : > { %3661 = vst [vmem:[%s5908_s15 + $0xf8] sm:$0xff] %v3629_v35 }
 0x46b   : > { %4821 = shalt.err (!%p4818_p3)
}
 0x46c   : > { %s4822_s29 = scalar_lea.hbm %s5975_s18, 4096  ;;  %s4826_s13 = scalar_lea.hbm %s6031_s7, 8192 }
 0x46d   : > { %p4823_p4 = scmp.ne.s32.totalorder %s5975_s18, %s4822_s29  ;;  %p4827_p9 = scmp.lt.u32.totalorder %s5975_s18, %s6031_s7 }
 0x46e   : > { %p4828_p10 = scmp.lt.u32.totalorder %s4826_s13, %s4822_s29  ;;  %p4830_p12 = scmp.lt.u32.totalorder %s4822_s29, %s5975_s18 }
 0x46f   : > { %p4824_p7 = pnand %p4823_p4, %p4954_p5 }
 0x470   : > { %p4829_p11 = por %p4828_p10, %p4827_p9 }
 0x471   : > { %p4825_p8 = pneg %p4824_p7 }
 0x472   : > { %p4831_p13 = por %p4830_p12, %p4829_p11 }
 0x474   : > { %p4832_p0 = pnand %p4831_p13, %p4825_p8 }
 0x476   : > { %4835 = shalt.err (!%p4832_p0)
}
 0x477   : > { %s4874_s23 = smov 128   ;;  %s4875_s17 = smov 8  }
 0x478   : > { %4395 = dma.vmem_to_hbm [thread:$0]  (%p4954_p5), %s5977_s14, 4096, %s5975_s18, %s5983_s28, %s4874_s23, %s4874_s23, %s4875_s17  }
 0x479 PF: > { %p4401_p1 = scmp.ge.s32.totalorder %s4870_s27, 2  ;;  %s3691_s19 = sand.u32 1, %s4858_s24  }
 0x47a   : > { %s3692_s20 = scalar_lea.sflag [#allocation3], %s3691_s19 }
 0x47b   : > { %p4398_p2 = pnand %p4401_p1, %p4958_p6 }
 0x47d   : > { %4853 = dma.done.wait (!%p4398_p2), %s3692_s20, 4096  }
 0x47e   : > { %4855 = vsyncadd (!%p4398_p2), %s3692_s20, 4294963200  ;;  %p17_p3 = scmp.ge.s32.totalorder %s4941_s30, 4   ;;  %s6080_s24 = smov %s4862_s25 }
 0x47f   : > { %s6081_s25 = smov %s4866_s26  ;;  %s6082_s26 = smov %s4952_s10 }
 0x480   : > { %s6083_s27 = smov %s4941_s30  ;;  %19 = sbr.rel (!%p17_p3) target bundleno = 3 (0x3), region = 83 }
 0x487   :  { %3697 = vsyncpa [#allocation3], 1 }
 0x488   :  { %3699 = vsyncpa [#allocation3 + $0x1], 1 }

</bundles_post_ra>
